<compile_context>
chip_gen: v7x
topology: tpu7x:2x2x1
jax: 0.10.0
libtpu: 0.0.40
codegen_flags: <defaults>
</compile_context>

<pallas_src>
import functools

import jax
import jax.numpy as jnp
from jax.experimental import pallas as pl
from jax.experimental.pallas import tpu as pltpu


def _leaky_relu(x, slope=0.1):
    return jnp.where(x > 0, x, slope * x)


def _round_up(n, m):
    return ((n + m - 1) // m) * m


def generator_kernel(x_ref,
                     w1_ref, b1_ref,
                     w2_ref, b2_ref,
                     w3_ref, b3_ref,
                     w4_ref, b4_ref,
                     o_ref):
    # Matmul operands in bf16, f32 accumulation on the MXU; elementwise f32.
    x = x_ref[...].astype(jnp.bfloat16)

    h = jnp.dot(x, w1_ref[...], preferred_element_type=jnp.float32) + b1_ref[...]
    h = _leaky_relu(h)

    h = jnp.dot(h.astype(jnp.bfloat16), w2_ref[...],
                preferred_element_type=jnp.float32) + b2_ref[...]
    h = _leaky_relu(h)

    h = jnp.dot(h.astype(jnp.bfloat16), w3_ref[...],
                preferred_element_type=jnp.float32) + b3_ref[...]
    h = _leaky_relu(h)

    h = jnp.dot(h.astype(jnp.bfloat16), w4_ref[...],
                preferred_element_type=jnp.float32) + b4_ref[...]
    o_ref[...] = jnp.tanh(h).astype(o_ref.dtype)


def prepare_params(params):
    """One-time layout prep (do this once, outside the step loop):
    torch-layout (out, in) weights -> (in, out) bf16; biases -> (1, out) f32;
    final feature dim zero-padded to a multiple of 128 for lane-dense stores.
    Returns (prepared_pytree, img_dim)."""
    prepared = {}
    img_dim = int(params["w4"].shape[0])
    for i in range(1, 5):
        w = jnp.asarray(params[f"w{i}"]).T          # (in, out)
        b = jnp.asarray(params[f"b{i}"])[None, :]   # (1, out)
        if i == 4:
            out_pad = _round_up(w.shape[1], 128)
            if out_pad != w.shape[1]:
                w = jnp.pad(w, ((0, 0), (0, out_pad - w.shape[1])))
                b = jnp.pad(b, ((0, 0), (0, out_pad - b.shape[1])))
        prepared[f"w{i}"] = w.astype(jnp.bfloat16)
        prepared[f"b{i}"] = b.astype(jnp.float32)
    return prepared, img_dim


@functools.partial(jax.jit, static_argnames=("img_dim",))
def generator_forward(x, prepared, img_dim):
    """x: (B, z_dim) float32.  prepared: output of prepare_params (cached)."""
    B, z_dim = x.shape
    w1, b1 = prepared["w1"], prepared["b1"]
    w2, b2 = prepared["w2"], prepared["b2"]
    w3, b3 = prepared["w3"], prepared["b3"]
    w4, b4 = prepared["w4"], prepared["b4"]
    out_pad = w4.shape[1]

    # Batch tiling: one "parallel" grid axis; weights use constant index_maps
    # so they stay VMEM-resident across batch tiles (no re-DMA).
    tile_b = min(256, _round_up(B, 8))
    b_pad = _round_up(B, tile_b)
    if b_pad != B:
        x = jnp.pad(x, ((0, b_pad - B), (0, 0)))
    grid = (b_pad // tile_b,)

    const = lambda a: pl.BlockSpec(a.shape, lambda i: (0, 0))

    d1, d2, d3 = w1.shape[1], w2.shape[1], w3.shape[1]
    flops = 2 * b_pad * (z_dim * d1 + d1 * d2 + d2 * d3 + d3 * out_pad)
    bytes_accessed = (
        x.size * 4 + b_pad * out_pad * 4
        + sum(prepared[f"w{i}"].size for i in range(1, 5)) * 2
        + sum(prepared[f"b{i}"].size for i in range(1, 5)) * 4)

    out = pl.pallas_call(
        generator_kernel,
        out_shape=jax.ShapeDtypeStruct((b_pad, out_pad), jnp.float32),
        grid=grid,
        in_specs=[pl.BlockSpec((tile_b, z_dim), lambda i: (i, 0)),
                  const(w1), const(b1),
                  const(w2), const(b2),
                  const(w3), const(b3),
                  const(w4), const(b4)],
        out_specs=pl.BlockSpec((tile_b, out_pad), lambda i: (i, 0)),
        compiler_params=pltpu.CompilerParams(
            dimension_semantics=("parallel",),
            vmem_limit_bytes=32 << 20),
        cost_estimate=pl.CostEstimate(
            flops=flops,
            transcendentals=b_pad * out_pad,
            bytes_accessed=bytes_accessed),
    )(x, w1, b1, w2, b2, w3, b3, w4, b4)

    return out[:B, :img_dim]


def init_params(key, z_dim, img_dim):
    """Deterministic init mimicking torch.nn.Linear's uniform(-1/sqrt(in), 1/sqrt(in)).
    Stored in torch layout (out, in) f32 — the 'master' weights."""
    dims = [(256, z_dim), (512, 256), (1024, 512), (img_dim, 1024)]
    params = {}
    for i, (out_d, in_d) in enumerate(dims, start=1):
        key, kw, kb = jax.random.split(key, 3)
        bound = 1.0 / jnp.sqrt(in_d)
        params[f"w{i}"] = jax.random.uniform(
            kw, (out_d, in_d), jnp.float32, -bound, bound)
        params[f"b{i}"] = jax.random.uniform(
            kb, (out_d,), jnp.float32, -bound, bound)
    return params


def generator_ref(x, params):
    """Pure-JAX f32 reference (matches PyTorch semantics)."""
    h = x
    for i in range(1, 4):
        h = h @ params[f"w{i}"].T + params[f"b{i}"]
        h = jnp.where(h > 0, h, 0.1 * h)
    h = h @ params["w4"].T + params["b4"]
    return jnp.tanh(h)


if __name__ == "__main__":
    z_dim, img_dim, batch = 64, 256, 8

    key = jax.random.PRNGKey(0)
    key, kx = jax.random.split(key)
    x = jax.random.normal(kx, (batch, z_dim), jnp.float32)
    params = init_params(key, z_dim, img_dim)

    # One-time layout/dtype prep (cached pytree; NOT done per forward call).
    prepared, out_dim = prepare_params(params)

    out = generator_forward(x, prepared, out_dim)
    out = jax.block_until_ready(out)

    ref = generator_ref(x, params)
    assert out.shape == (batch, img_dim)
    # bf16 matmul operands (f32 accumulation) -> loosened tolerance vs f32 ref.
    assert jnp.allclose(out, ref, atol=2e-2, rtol=2e-2), "mismatch vs reference"

    print("KERNEL_OK")
</pallas_src>

<mosaic_0001>
module attributes {stable_mosaic.version = 11 : i64} {
  func.func @generator_kernel(%arg0: i32, %arg1: memref<8x64xf32, #tpu.memory_space<vmem>>, %arg2: memref<64x256xbf16, #tpu.memory_space<vmem>>, %arg3: memref<1x256xf32, #tpu.memory_space<vmem>>, %arg4: memref<256x512xbf16, #tpu.memory_space<vmem>>, %arg5: memref<1x512xf32, #tpu.memory_space<vmem>>, %arg6: memref<512x1024xbf16, #tpu.memory_space<vmem>>, %arg7: memref<1x1024xf32, #tpu.memory_space<vmem>>, %arg8: memref<1024x256xbf16, #tpu.memory_space<vmem>>, %arg9: memref<1x256xf32, #tpu.memory_space<vmem>>, %arg10: memref<8x256xf32, #tpu.memory_space<vmem>>) attributes {dimension_semantics = [#tpu.dimension_semantics<parallel>], iteration_bounds = array<i64: 1>, scalar_prefetch = 0 : i64, scratch_operands = 0 : i64, tpu.core_type = #tpu.core_type<tc>, window_params = [{transform_indices = @transform_0, window_bounds = array<i64: 8, 64>}, {pipeline_mode = #tpu.pipeline_mode<synchronous>, transform_indices = @transform_1, window_bounds = array<i64: 64, 256>}, {pipeline_mode = #tpu.pipeline_mode<synchronous>, transform_indices = @transform_2, window_bounds = array<i64: 1, 256>}, {pipeline_mode = #tpu.pipeline_mode<synchronous>, transform_indices = @transform_3, window_bounds = array<i64: 256, 512>}, {pipeline_mode = #tpu.pipeline_mode<synchronous>, transform_indices = @transform_4, window_bounds = array<i64: 1, 512>}, {pipeline_mode = #tpu.pipeline_mode<synchronous>, transform_indices = @transform_5, window_bounds = array<i64: 512, 1024>}, {pipeline_mode = #tpu.pipeline_mode<synchronous>, transform_indices = @transform_6, window_bounds = array<i64: 1, 1024>}, {pipeline_mode = #tpu.pipeline_mode<synchronous>, transform_indices = @transform_7, window_bounds = array<i64: 1024, 256>}, {pipeline_mode = #tpu.pipeline_mode<synchronous>, transform_indices = @transform_8, window_bounds = array<i64: 1, 256>}, {transform_indices = @transform_9, window_bounds = array<i64: 8, 256>}]} {
    %c0 = arith.constant 0 : index
    %c0_0 = arith.constant 0 : index
    %0 = vector.load %arg1[%c0, %c0_0] : memref<8x64xf32, #tpu.memory_space<vmem>>, vector<8x64xf32>
    %1 = arith.truncf %0 : vector<8x64xf32> to vector<8x64xbf16>
    %c0_1 = arith.constant 0 : index
    %c0_2 = arith.constant 0 : index
    %2 = vector.load %arg2[%c0_1, %c0_2] : memref<64x256xbf16, #tpu.memory_space<vmem>>, vector<64x256xbf16>
    %cst = arith.constant dense<0.000000e+00> : vector<8x256xf32>
    %3 = tpu.matmul %1, %2, %cst {dimension_numbers = #tpu.dot_dimension_numbers<[1], [0], [0], [1], [0, 0, 1, 1], [], []>} : vector<8x64xbf16>, vector<64x256xbf16>, vector<8x256xf32> -> vector<8x256xf32>
    %c0_3 = arith.constant 0 : index
    %c0_4 = arith.constant 0 : index
    %4 = vector.load %arg3[%c0_3, %c0_4] : memref<1x256xf32, #tpu.memory_space<vmem>>, vector<1x256xf32>
    %5 = vector.broadcast %4 : vector<1x256xf32> to vector<8x256xf32>
    %6 = arith.addf %3, %5 : vector<8x256xf32>
    %cst_5 = arith.constant 0.000000e+00 : f32
    %7 = vector.broadcast %cst_5 : f32 to vector<8x256xf32>
    %8 = arith.cmpf ogt, %6, %7 : vector<8x256xf32>
    %cst_6 = arith.constant 1.000000e-01 : f32
    %9 = vector.broadcast %cst_6 : f32 to vector<8x256xf32>
    %10 = arith.mulf %9, %6 : vector<8x256xf32>
    %11 = arith.select %8, %6, %10 : vector<8x256xi1>, vector<8x256xf32>
    %12 = arith.truncf %11 : vector<8x256xf32> to vector<8x256xbf16>
    %c0_7 = arith.constant 0 : index
    %c0_8 = arith.constant 0 : index
    %13 = vector.load %arg4[%c0_7, %c0_8] : memref<256x512xbf16, #tpu.memory_space<vmem>>, vector<256x512xbf16>
    %cst_9 = arith.constant dense<0.000000e+00> : vector<8x512xf32>
    %14 = tpu.matmul %12, %13, %cst_9 {dimension_numbers = #tpu.dot_dimension_numbers<[1], [0], [0], [1], [0, 0, 1, 1], [], []>} : vector<8x256xbf16>, vector<256x512xbf16>, vector<8x512xf32> -> vector<8x512xf32>
    %c0_10 = arith.constant 0 : index
    %c0_11 = arith.constant 0 : index
    %15 = vector.load %arg5[%c0_10, %c0_11] : memref<1x512xf32, #tpu.memory_space<vmem>>, vector<1x512xf32>
    %16 = vector.broadcast %15 : vector<1x512xf32> to vector<8x512xf32>
    %17 = arith.addf %14, %16 : vector<8x512xf32>
    %cst_12 = arith.constant 0.000000e+00 : f32
    %18 = vector.broadcast %cst_12 : f32 to vector<8x512xf32>
    %19 = arith.cmpf ogt, %17, %18 : vector<8x512xf32>
    %cst_13 = arith.constant 1.000000e-01 : f32
    %20 = vector.broadcast %cst_13 : f32 to vector<8x512xf32>
    %21 = arith.mulf %20, %17 : vector<8x512xf32>
    %22 = arith.select %19, %17, %21 : vector<8x512xi1>, vector<8x512xf32>
    %23 = arith.truncf %22 : vector<8x512xf32> to vector<8x512xbf16>
    %c0_14 = arith.constant 0 : index
    %c0_15 = arith.constant 0 : index
    %24 = vector.load %arg6[%c0_14, %c0_15] : memref<512x1024xbf16, #tpu.memory_space<vmem>>, vector<512x1024xbf16>
    %cst_16 = arith.constant dense<0.000000e+00> : vector<8x1024xf32>
    %25 = tpu.matmul %23, %24, %cst_16 {dimension_numbers = #tpu.dot_dimension_numbers<[1], [0], [0], [1], [0, 0, 1, 1], [], []>} : vector<8x512xbf16>, vector<512x1024xbf16>, vector<8x1024xf32> -> vector<8x1024xf32>
    %c0_17 = arith.constant 0 : index
    %c0_18 = arith.constant 0 : index
    %26 = vector.load %arg7[%c0_17, %c0_18] : memref<1x1024xf32, #tpu.memory_space<vmem>>, vector<1x1024xf32>
    %27 = vector.broadcast %26 : vector<1x1024xf32> to vector<8x1024xf32>
    %28 = arith.addf %25, %27 : vector<8x1024xf32>
    %cst_19 = arith.constant 0.000000e+00 : f32
    %29 = vector.broadcast %cst_19 : f32 to vector<8x1024xf32>
    %30 = arith.cmpf ogt, %28, %29 : vector<8x1024xf32>
    %cst_20 = arith.constant 1.000000e-01 : f32
    %31 = vector.broadcast %cst_20 : f32 to vector<8x1024xf32>
    %32 = arith.mulf %31, %28 : vector<8x1024xf32>
    %33 = arith.select %30, %28, %32 : vector<8x1024xi1>, vector<8x1024xf32>
    %34 = arith.truncf %33 : vector<8x1024xf32> to vector<8x1024xbf16>
    %c0_21 = arith.constant 0 : index
    %c0_22 = arith.constant 0 : index
    %35 = vector.load %arg8[%c0_21, %c0_22] : memref<1024x256xbf16, #tpu.memory_space<vmem>>, vector<1024x256xbf16>
    %cst_23 = arith.constant dense<0.000000e+00> : vector<8x256xf32>
    %36 = tpu.matmul %34, %35, %cst_23 {dimension_numbers = #tpu.dot_dimension_numbers<[1], [0], [0], [1], [0, 0, 1, 1], [], []>} : vector<8x1024xbf16>, vector<1024x256xbf16>, vector<8x256xf32> -> vector<8x256xf32>
    %c0_24 = arith.constant 0 : index
    %c0_25 = arith.constant 0 : index
    %37 = vector.load %arg9[%c0_24, %c0_25] : memref<1x256xf32, #tpu.memory_space<vmem>>, vector<1x256xf32>
    %38 = vector.broadcast %37 : vector<1x256xf32> to vector<8x256xf32>
    %39 = arith.addf %36, %38 : vector<8x256xf32>
    %40 = math.tanh %39 : vector<8x256xf32>
    %c0_26 = arith.constant 0 : index
    %c0_27 = arith.constant 0 : index
    %41 = vector.load %arg10[%c0_26, %c0_27] : memref<8x256xf32, #tpu.memory_space<vmem>>, vector<8x256xf32>
    tpu.vector_store %arg10[%c0_26, %c0_27], %40 {strides = array<i32>} : memref<8x256xf32, #tpu.memory_space<vmem>>, vector<8x256xf32>,
    return
  }
  func.func @transform_0(%arg0: i32) -> (i32, i32) {
    %c0_i32 = arith.constant 0 : i32
    %c0_i32_0 = arith.constant 0 : i32
    return %arg0, %c0_i32 : i32, i32
  }
  func.func @transform_1(%arg0: i32) -> (i32, i32) {
    %c0_i32 = arith.constant 0 : i32
    %c0_i32_0 = arith.constant 0 : i32
    %c0_i32_1 = arith.constant 0 : i32
    return %c0_i32, %c0_i32_0 : i32, i32
  }
  func.func @transform_2(%arg0: i32) -> (i32, i32) {
    %c0_i32 = arith.constant 0 : i32
    %c0_i32_0 = arith.constant 0 : i32
    %c0_i32_1 = arith.constant 0 : i32
    return %c0_i32, %c0_i32_0 : i32, i32
  }
  func.func @transform_3(%arg0: i32) -> (i32, i32) {
    %c0_i32 = arith.constant 0 : i32
    %c0_i32_0 = arith.constant 0 : i32
    %c0_i32_1 = arith.constant 0 : i32
    return %c0_i32, %c0_i32_0 : i32, i32
  }
  func.func @transform_4(%arg0: i32) -> (i32, i32) {
    %c0_i32 = arith.constant 0 : i32
    %c0_i32_0 = arith.constant 0 : i32
    %c0_i32_1 = arith.constant 0 : i32
    return %c0_i32, %c0_i32_0 : i32, i32
  }
  func.func @transform_5(%arg0: i32) -> (i32, i32) {
    %c0_i32 = arith.constant 0 : i32
    %c0_i32_0 = arith.constant 0 : i32
    %c0_i32_1 = arith.constant 0 : i32
    return %c0_i32, %c0_i32_0 : i32, i32
  }
  func.func @transform_6(%arg0: i32) -> (i32, i32) {
    %c0_i32 = arith.constant 0 : i32
    %c0_i32_0 = arith.constant 0 : i32
    %c0_i32_1 = arith.constant 0 : i32
    return %c0_i32, %c0_i32_0 : i32, i32
  }
  func.func @transform_7(%arg0: i32) -> (i32, i32) {
    %c0_i32 = arith.constant 0 : i32
    %c0_i32_0 = arith.constant 0 : i32
    %c0_i32_1 = arith.constant 0 : i32
    return %c0_i32, %c0_i32_0 : i32, i32
  }
  func.func @transform_8(%arg0: i32) -> (i32, i32) {
    %c0_i32 = arith.constant 0 : i32
    %c0_i32_0 = arith.constant 0 : i32
    %c0_i32_1 = arith.constant 0 : i32
    return %c0_i32, %c0_i32_0 : i32, i32
  }
  func.func @transform_9(%arg0: i32) -> (i32, i32) {
    %c0_i32 = arith.constant 0 : i32
    %c0_i32_0 = arith.constant 0 : i32
    return %arg0, %c0_i32 : i32, i32
  }
}

</mosaic_0001>

<bundles_post_ra>
// kernel: generator_forward.1
= control target key start
LH: loop header
LB: loop body
LE: loop exit
PB: predicated region body
PF: predicated region fallthrough
CT: control target
= control target key end

     0   :  { %14 = vsyncpa [#allocation3], 0  ;;  %s4875_s0 = inlined_call_operand.hbm [shape: f32[8,64], index: 0, kind: input, shape index: {}]   ;;  %s4876_s1 = inlined_call_operand.hbm [shape: bf16[64,256], index: 1, kind: input, shape index: {}]   ;;  %s4877_s2 = inlined_call_operand.vmem [shape: f32[1,256], index: 2, kind: input, shape index: {}]   ;;  %s4878_s3 = inlined_call_operand.hbm [shape: bf16[256,512], index: 3, kind: input, shape index: {}]   ;;  %s4879_s4 = inlined_call_operand.hbm [shape: f32[1,512], index: 4, kind: input, shape index: {}]   ;;  %s4880_s5 = inlined_call_operand.hbm [shape: bf16[512,1024], index: 5, kind: input, shape index: {}]   ;;  %s4881_s6 = inlined_call_operand.vmem [shape: f32[1,1024], index: 6, kind: input, shape index: {}]   ;;  %s4882_s7 = inlined_call_operand.hbm [shape: bf16[1024,256], index: 7, kind: input, shape index: {}]   ;;  %s4883_s8 = inlined_call_operand.vmem [shape: f32[1,256], index: 8, kind: input, shape index: {}]   ;;  %s4884_s9 = inlined_call_operand.hbm [shape: f32[8,256], index: 9, kind: output, shape index: {}]  }
   0x1   :  { %15 = vsyncpa [#allocation6], 0 }
   0x2   :  { %16 = vsyncpa [#allocation9], 0 }
   0x3   :  { %17 = vsyncpa [#allocation12], 0 }
   0x4   :  { %18 = vsyncpa [#allocation4], 0  ;;  %s4610_s30 = smov [#allocation5]   ;;  %s4446_s13 = scalar_lea.hbm %s4876_s1, 1024 }
   0x5   :  { %s34_s10 = sshll.u32 %s4610_s30, 4  ;;  %p4447_p0 = scmp.ne.s32.totalorder %s4876_s1, %s4446_s13  ;;  %s35_s10 = int_to_ptr.vmem [resolvable:$true] %s34_s10 }
   0x6   :  { %p4450_p1 = scmp.lt.u32.totalorder %s4446_s13, %s4876_s1 }
   0x8   :  { %p4452_p2 = pnand %p4450_p1, %p4447_p0 }
   0xa   :  { %4455 = shalt.err (!%p4452_p2)
}
   0xb   :  { %s4456_s18 = scalar_lea.vmem %s35_s10, 1024  ;;  %p4461_p4 = scmp.lt.s32.totalorder %s35_s10, %s35_s10 }
   0xc   :  { %p4457_p3 = scmp.ne.s32.totalorder %s35_s10, %s4456_s18  ;;  %p4462_p5 = scmp.lt.s32.totalorder %s4456_s18, %s4456_s18 }
   0xe   :  { %p4463_p6 = por %p4462_p5, %p4461_p4 }
  0x10   :  { %p4464_p7 = pnand %p4463_p6, %p4457_p3 }
  0x12   :  { %4467 = shalt.err (!%p4464_p7)
}
  0x13   :  { %s4611_s19 = smov 128   ;;  %s4612_s20 = smov 8  }
  0x14   :  { %40 = dma.hbm_to_vmem [thread:$0]  %s4876_s1, 1024, %s35_s10, [#allocation6], %s4611_s19, %s4611_s19, %s4612_s20  }
  0x15   :  { %s4613_s23 = smov [#allocation8]   ;;  %s4614_s25 = smov [#allocation2]  }
  0x16   :  { %s61_s24 = sshll.u32 %s4613_s23, 4  ;;  %s25_s26 = sshll.u32 %s4614_s25, 4  ;;  %s62_s24 = int_to_ptr.vmem [resolvable:$true] %s61_s24  ;;  %s26_s26 = int_to_ptr.vmem [resolvable:$true] %s25_s26 }
  0x17   :  { %s4468_s29 = scalar_lea.hbm %s4879_s4, 64 }
  0x18   :  { %p4469_p8 = scmp.ne.s32.totalorder %s4879_s4, %s4468_s29  ;;  %p4472_p9 = scmp.lt.u32.totalorder %s4468_s29, %s4879_s4 }
  0x1a   :  { %p4474_p10 = pnand %p4472_p9, %p4469_p8 }
  0x1c   :  { %4477 = shalt.err (!%p4474_p10)
}
  0x1d   :  { %s4478_s1 = scalar_lea.vmem %s62_s24, 64  ;;  %p4483_p12 = scmp.lt.s32.totalorder %s62_s24, %s62_s24 }
  0x1e   :  { %p4479_p11 = scmp.ne.s32.totalorder %s62_s24, %s4478_s1  ;;  %p4484_p13 = scmp.lt.s32.totalorder %s4478_s1, %s4478_s1 }
  0x20   :  { %p4485_p0 = por %p4484_p13, %p4483_p12 }
  0x22   :  { %p4486_p1 = pnand %p4485_p0, %p4479_p11 }
  0x24   :  { %4489 = shalt.err (!%p4486_p1)
}
  0x25   :  { %64 = dma.hbm_to_vmem [thread:$0]  %s4879_s4, 64, %s62_s24, [#allocation9]  }
  0x26   :  { %s4490_s17 = scalar_lea.hbm %s4875_s0, 128 }
  0x27   :  { %p4491_p2 = scmp.ne.s32.totalorder %s4875_s0, %s4490_s17  ;;  %p4494_p3 = scmp.lt.u32.totalorder %s4490_s17, %s4875_s0 }
  0x29   :  { %p4496_p4 = pnand %p4494_p3, %p4491_p2 }
  0x2b   :  { %4499 = shalt.err (!%p4496_p4)
}
  0x2c   :  { %s4500_s25 = scalar_lea.vmem %s26_s26, 128  ;;  %p4505_p6 = scmp.lt.s32.totalorder %s26_s26, %s26_s26 }
  0x2d   :  { %p4501_p5 = scmp.ne.s32.totalorder %s26_s26, %s4500_s25  ;;  %p4506_p7 = scmp.lt.s32.totalorder %s4500_s25, %s4500_s25 }
  0x2f   :  { %p4507_p8 = por %p4506_p7, %p4505_p6 }
  0x31   :  { %p4508_p9 = pnand %p4507_p8, %p4501_p5 }
  0x33   :  { %4511 = shalt.err (!%p4508_p9)
}
  0x34   :  { %28 = dma.hbm_to_vmem [thread:$0]  %s4875_s0, 128, %s26_s26, [#allocation3]  }
  0x35   :  { %s4615_s27 = smov [#allocation7]   ;;  %s4512_s11 = scalar_lea.hbm %s4878_s3, 8192 }
  0x36   :  { %s48_s28 = sshll.u32 %s4615_s27, 4  ;;  %p4513_p10 = scmp.ne.s32.totalorder %s4878_s3, %s4512_s11  ;;  %s49_s28 = int_to_ptr.vmem [resolvable:$true] %s48_s28 }
  0x37   :  { %p4516_p11 = scmp.lt.u32.totalorder %s4512_s11, %s4878_s3 }
  0x39   :  { %p4518_p12 = pnand %p4516_p11, %p4513_p10 }
  0x3b   :  { %4521 = shalt.err (!%p4518_p12)
}
  0x3c   :  { %s4522_s14 = scalar_lea.vmem %s49_s28, 8192  ;;  %p4527_p0 = scmp.lt.s32.totalorder %s49_s28, %s49_s28 }
  0x3d   :  { %p4523_p13 = scmp.ne.s32.totalorder %s49_s28, %s4522_s14  ;;  %p4528_p1 = scmp.lt.s32.totalorder %s4522_s14, %s4522_s14 }
  0x3f   :  { %p4529_p2 = por %p4528_p1, %p4527_p0 }
  0x41   :  { %p4530_p3 = pnand %p4529_p2, %p4523_p13 }
  0x43   :  { %4533 = shalt.err (!%p4530_p3)
}
  0x44   :  { %s4616_s0 = smov 256   ;;  %s4617_s26 = smov 16  }
  0x45   :  { %54 = dma.hbm_to_vmem [thread:$0]  %s4878_s3, 8192, %s49_s28, [#allocation6], %s4616_s0, %s4616_s0, %s4617_s26  }
  0x46   :  { %s4618_s17 = smov [#allocation10]   ;;  %s4534_s23 = scalar_lea.hbm %s4880_s5, 32768 }
  0x47   :  { %s70_s18 = sshll.u32 %s4618_s17, 4  ;;  %p4535_p4 = scmp.ne.s32.totalorder %s4880_s5, %s4534_s23  ;;  %s71_s18 = int_to_ptr.vmem [resolvable:$true] %s70_s18 }
  0x48   :  { %p4538_p5 = scmp.lt.u32.totalorder %s4534_s23, %s4880_s5 }
  0x4a   :  { %p4540_p6 = pnand %p4538_p5, %p4535_p4 }
  0x4c   :  { %4543 = shalt.err (!%p4540_p6)
}
  0x4d   :  { %s4544_s29 = scalar_lea.vmem %s71_s18, 32768  ;;  %p4549_p8 = scmp.lt.s32.totalorder %s71_s18, %s71_s18 }
  0x4e   :  { %p4545_p7 = scmp.ne.s32.totalorder %s71_s18, %s4544_s29  ;;  %p4550_p9 = scmp.lt.s32.totalorder %s4544_s29, %s4544_s29 }
  0x50   :  { %p4551_p10 = por %p4550_p9, %p4549_p8 }
  0x52   :  { %p4552_p11 = pnand %p4551_p10, %p4545_p7 }
  0x54   :  { %4555 = shalt.err (!%p4552_p11)
}
  0x55   :  { %s4619_s3 = smov 512   ;;  %s4620_s28 = smov 32  }
  0x56   :  { %76 = dma.hbm_to_vmem [thread:$0]  %s4880_s5, 32768, %s71_s18, [#allocation9], %s4619_s3, %s4619_s3, %s4620_s28  }
  0x57   :  { %s4621_s12 = smov [#allocation11]   ;;  %s4556_s14 = scalar_lea.hbm %s4882_s7, 16384 }
  0x58   :  { %s84_s13 = sshll.u32 %s4621_s12, 4  ;;  %p4557_p12 = scmp.ne.s32.totalorder %s4882_s7, %s4556_s14  ;;  %s85_s13 = int_to_ptr.vmem [resolvable:$true] %s84_s13 }
  0x59   :  { %p4560_p13 = scmp.lt.u32.totalorder %s4556_s14, %s4882_s7 }
  0x5b   :  { %p4562_p0 = pnand %p4560_p13, %p4557_p12 }
  0x5d   :  { %4565 = shalt.err (!%p4562_p0)
}
  0x5e   :  { %s4566_s17 = scalar_lea.vmem %s85_s13, 16384  ;;  %p4571_p2 = scmp.lt.s32.totalorder %s85_s13, %s85_s13 }
  0x5f   :  { %p4567_p1 = scmp.ne.s32.totalorder %s85_s13, %s4566_s17  ;;  %p4572_p3 = scmp.lt.s32.totalorder %s4566_s17, %s4566_s17 }
  0x61   :  { %p4573_p4 = por %p4572_p3, %p4571_p2 }
  0x63   :  { %p4574_p5 = pnand %p4573_p4, %p4567_p1 }
  0x65   :  { %4577 = shalt.err (!%p4574_p5)
}
  0x66   :  { %90 = dma.hbm_to_vmem [thread:$0]  %s4882_s7, 16384, %s85_s13, [#allocation12], %s4611_s19, %s4611_s19, %s4612_s20  }
  0x67   :  { %4600 = dma.done.wait [#allocation3], 128  }
  0x68   :  { %4601 = vsyncadd [#allocation3], 4294967168 }
  0x69   :  { %4602 = dma.done.wait [#allocation6], 9216  }
  0x6a   :  { %4603 = vsyncadd [#allocation6], 4294958080 }
  0x6b   :  { %4604 = dma.done.wait [#allocation9], 32832  }
  0x6c   :  { %4605 = vsyncadd [#allocation9], 4294934464 }
  0x6d   :  { %4606 = dma.done.wait [#allocation12], 16384  }
  0x6e   :  { %4607 = vsyncadd [#allocation12], 4294950912  ;;  %v4622_v0 = vmov 0   ;;  %v4142_v1 = vld [vmem:[#allocation5 + $0x4] ss:$8 sps:$4 sm:$0xff]   ;;  %v112_v9 = vld [vmem:[#allocation2] sm:$0xff]  ;;  %v124_v44 = vlaneseq }
  0x6f   :  { %210 = vmatprep.mubr.bf16.mxu0 %v4622_v0  ;;  %v4144_v2 = vld [vmem:[#allocation5] ss:$8 sps:$4 sm:$0xff]   ;;  %178 = vmatprep.subr.bf16.mxu0 %v4142_v1  ;;  %v4145_v3 = vld [vmem:[#allocation5 + $0x14] ss:$8 sps:$4 sm:$0xff]   ;;  %v4147_v4 = vld [vmem:[#allocation5 + $0x10] ss:$8 sps:$4 sm:$0xff]   ;;  %v113_v11 = vpack.c.bf16 %v112_v9, %v112_v9 }
  0x70   :  { %179 = vmatpush1.bf16.msra.mxu0 %v4144_v2  ;;  %v4148_v5 = vld [vmem:[#allocation5 + $0x24] ss:$8 sps:$4 sm:$0xff]   ;;  %v4150_v6 = vld [vmem:[#allocation5 + $0x20] ss:$8 sps:$4 sm:$0xff]   ;;  %v4151_v7 = vld [vmem:[#allocation5 + $0x34] ss:$8 sps:$4 sm:$0xff]  }
  0x71   :  { %180 = vmatprep.subr.bf16.mxu0 %v4145_v3  ;;  %v4153_v8 = vld [vmem:[#allocation5 + $0x30] ss:$8 sps:$4 sm:$0xff]   ;;  %v4156_v10 = vld [vmem:[#allocation7 + $0x4] ss:$16 sps:$4 sm:$0xff]   ;;  %vm174_vm0 = vcmask 523264   ;;  %v4752_v45 = vshrl.u32 %v124_v44, 7 }
  0x72   :  { %v4154_v12 = vld [vmem:[#allocation7] ss:$16 sps:$4 sm:$0xff]   ;;  %v4159_v13 = vld [vmem:[#allocation7 + $0x24] ss:$16 sps:$4 sm:$0xff]   ;;  %v4204_v43 = vld [vmem:[#allocation7 + $0xc] ss:$16 sps:$4 sm:$0xff]  }
  0x73   :  { %v4157_v14 = vld [vmem:[#allocation7 + $0x20] ss:$16 sps:$4 sm:$0xff]   ;;  %v4162_v15 = vld [vmem:[#allocation7 + $0x44] ss:$16 sps:$4 sm:$0xff]   ;;  %v4755_v46 = vsub.s32 0, %v4752_v45  ;;  %v4761_v48 = vsub.s32 1, %v4752_v45 }
  0x74   :  { %181 = vmatpush1.bf16.msra.mxu0 %v4147_v4  ;;  %v4160_v16 = vld [vmem:[#allocation7 + $0x40] ss:$16 sps:$4 sm:$0xff]   ;;  %v4165_v17 = vld [vmem:[#allocation7 + $0x64] ss:$16 sps:$4 sm:$0xff]   ;;  %v122_v47 = vld [vmem:[%s4877_s2] sm:$0x3] }
  0x75   :  { %182 = vmatprep.subr.bf16.mxu0 %v4148_v5  ;;  %v4163_v18 = vld [vmem:[#allocation7 + $0x60] ss:$16 sps:$4 sm:$0xff]   ;;  %v4168_v19 = vld [vmem:[#allocation7 + $0x84] ss:$16 sps:$4 sm:$0xff]   ;;  %v127_v49 = vrot.slane %v122_v47, %v4755_v46  ;;  %v131_v50 = vrot.slane %v122_v47, %v4761_v48  ;;  %v4202_v62 = vld [vmem:[#allocation7 + $0x8] ss:$16 sps:$4 sm:$0xff]  }
  0x76   :  { %v4166_v20 = vld [vmem:[#allocation7 + $0x80] ss:$16 sps:$4 sm:$0xff]   ;;  %v4171_v21 = vld [vmem:[#allocation7 + $0xa4] ss:$16 sps:$4 sm:$0xff]   ;;  %v4207_v0 = vld [vmem:[#allocation7 + $0x2c] ss:$16 sps:$4 sm:$0xff]  }
  0x77   :  { %v4169_v22 = vld [vmem:[#allocation7 + $0xa0] ss:$16 sps:$4 sm:$0xff]   ;;  %v4174_v23 = vld [vmem:[#allocation7 + $0xc4] ss:$16 sps:$4 sm:$0xff]   ;;  %v4205_v1 = vld [vmem:[#allocation7 + $0x28] ss:$16 sps:$4 sm:$0xff]  }
  0x78   :  { %183 = vmatpush1.bf16.msra.mxu0 %v4150_v6  ;;  %v4172_v24 = vld [vmem:[#allocation7 + $0xc0] ss:$16 sps:$4 sm:$0xff]   ;;  %v4177_v25 = vld [vmem:[#allocation7 + $0xe4] ss:$16 sps:$4 sm:$0xff]   ;;  %v4210_v2 = vld [vmem:[#allocation7 + $0x4c] ss:$16 sps:$4 sm:$0xff]  }
  0x79   :  { %184 = vmatprep.subr.bf16.mxu0 %v4151_v7  ;;  %v4175_v26 = vld [vmem:[#allocation7 + $0xe0] ss:$16 sps:$4 sm:$0xff]   ;;  %v4180_v27 = vld [vmem:[#allocation7 + $0x104] ss:$16 sps:$4 sm:$0xff]   ;;  %v4208_v3 = vld [vmem:[#allocation7 + $0x48] ss:$16 sps:$4 sm:$0xff]  }
  0x7a   :  { %v4178_v28 = vld [vmem:[#allocation7 + $0x100] ss:$16 sps:$4 sm:$0xff]   ;;  %v4183_v29 = vld [vmem:[#allocation7 + $0x124] ss:$16 sps:$4 sm:$0xff]   ;;  %v4213_v4 = vld [vmem:[#allocation7 + $0x6c] ss:$16 sps:$4 sm:$0xff]  }
  0x7b   :  { %v4181_v30 = vld [vmem:[#allocation7 + $0x120] ss:$16 sps:$4 sm:$0xff]   ;;  %v4186_v31 = vld [vmem:[#allocation7 + $0x144] ss:$16 sps:$4 sm:$0xff]   ;;  %v4211_v5 = vld [vmem:[#allocation7 + $0x68] ss:$16 sps:$4 sm:$0xff]  }
  0x7c   :  { %185 = vmatpush1.bf16.msra.mxu0 %v4153_v8  ;;  %v4184_v32 = vld [vmem:[#allocation7 + $0x140] ss:$16 sps:$4 sm:$0xff]   ;;  %v4189_v33 = vld [vmem:[#allocation7 + $0x164] ss:$16 sps:$4 sm:$0xff]   ;;  %v4216_v6 = vld [vmem:[#allocation7 + $0x8c] ss:$16 sps:$4 sm:$0xff]  }
  0x7d   :  { %633 = vmatprep.subr.bf16.mxu0 %v4156_v10  ;;  %v4187_v34 = vld [vmem:[#allocation7 + $0x160] ss:$16 sps:$4 sm:$0xff]   ;;  %v4192_v35 = vld [vmem:[#allocation7 + $0x184] ss:$16 sps:$4 sm:$0xff]   ;;  %v4214_v7 = vld [vmem:[#allocation7 + $0x88] ss:$16 sps:$4 sm:$0xff]  }
  0x7e   :  { %v4190_v36 = vld [vmem:[#allocation7 + $0x180] ss:$16 sps:$4 sm:$0xff]   ;;  %v4195_v37 = vld [vmem:[#allocation7 + $0x1a4] ss:$16 sps:$4 sm:$0xff]   ;;  %v4219_v8 = vld [vmem:[#allocation7 + $0xac] ss:$16 sps:$4 sm:$0xff]  }
  0x7f   :  { %3643 = vmatmul.mubr.msk.bf16.vlgmr.msra.gmra.mrb[0].mxu0 %vm174_vm0, %v113_v11  ;;  %v4193_v38 = vld [vmem:[#allocation7 + $0x1a0] ss:$16 sps:$4 sm:$0xff]   ;;  %v4198_v39 = vld [vmem:[#allocation7 + $0x1c4] ss:$16 sps:$4 sm:$0xff]   ;;  %v4217_v9 = vld [vmem:[#allocation7 + $0xa8] ss:$16 sps:$4 sm:$0xff]  }
  0x80   :  { %634 = vmatpush1.bf16.msra.mxu0 %v4154_v12  ;;  %v4196_v40 = vld [vmem:[#allocation7 + $0x1c0] ss:$16 sps:$4 sm:$0xff]   ;;  %v4201_v41 = vld [vmem:[#allocation7 + $0x1e4] ss:$16 sps:$4 sm:$0xff]   ;;  %v4222_v10 = vld [vmem:[#allocation7 + $0xcc] ss:$16 sps:$4 sm:$0xff]  }
  0x81   :  { %635 = vmatprep.subr.bf16.mxu0 %v4159_v13  ;;  %v4199_v42 = vld [vmem:[#allocation7 + $0x1e0] ss:$16 sps:$4 sm:$0xff]   ;;  %v4220_v11 = vld [vmem:[#allocation7 + $0xc8] ss:$16 sps:$4 sm:$0xff]   ;;  %v4225_v12 = vld [vmem:[#allocation7 + $0xec] ss:$16 sps:$4 sm:$0xff]  }
  0x82   :  { %v4223_v13 = vld [vmem:[#allocation7 + $0xe8] ss:$16 sps:$4 sm:$0xff]   ;;  %s4623_s22 = smov [#allocation13]  }
  0x83   :  { %v763_v47 = vld [vmem:[#allocation10 + $0x100] sm:$0xff]  ;;  %s3623_s23 = sshll.u32 %s4623_s22, 4  ;;  %s3624_s23 = int_to_ptr.vmem [resolvable:$true] %s3623_s23 }
  0x84   :  { %636 = vmatpush1.bf16.msra.mxu0 %v4157_v14  ;;  %v4228_v14 = vld [vmem:[#allocation7 + $0x10c] ss:$16 sps:$4 sm:$0xff]   ;;  %p4583_p7 = scmp.lt.s32.totalorder %s3624_s23, %s3624_s23 }
  0x85   :  { %637 = vmatprep.subr.bf16.mxu0 %v4162_v15  ;;  %v4226_v15 = vld [vmem:[#allocation7 + $0x108] ss:$16 sps:$4 sm:$0xff]  }
  0x88   :  { %638 = vmatpush1.bf16.msra.mxu0 %v4160_v16  ;;  %v4231_v16 = vld [vmem:[#allocation7 + $0x12c] ss:$16 sps:$4 sm:$0xff]  }
  0x89   :  { %639 = vmatprep.subr.bf16.mxu0 %v4165_v17  ;;  %v4229_v17 = vld [vmem:[#allocation7 + $0x128] ss:$16 sps:$4 sm:$0xff]  }
  0x8c   :  { %640 = vmatpush1.bf16.msra.mxu0 %v4163_v18  ;;  %v4234_v18 = vld [vmem:[#allocation7 + $0x14c] ss:$16 sps:$4 sm:$0xff]  }
  0x8d   :  { %641 = vmatprep.subr.bf16.mxu0 %v4168_v19  ;;  %v4232_v19 = vld [vmem:[#allocation7 + $0x148] ss:$16 sps:$4 sm:$0xff]  }
  0x90   :  { %642 = vmatpush1.bf16.msra.mxu0 %v4166_v20  ;;  %v4237_v20 = vld [vmem:[#allocation7 + $0x16c] ss:$16 sps:$4 sm:$0xff]  }
  0x91   :  { %643 = vmatprep.subr.bf16.mxu0 %v4171_v21  ;;  %v4235_v21 = vld [vmem:[#allocation7 + $0x168] ss:$16 sps:$4 sm:$0xff]  }
  0x94   :  { %644 = vmatpush1.bf16.msra.mxu0 %v4169_v22  ;;  %v4240_v22 = vld [vmem:[#allocation7 + $0x18c] ss:$16 sps:$4 sm:$0xff]  }
  0x95   :  { %645 = vmatprep.subr.bf16.mxu0 %v4174_v23  ;;  %v4238_v23 = vld [vmem:[#allocation7 + $0x188] ss:$16 sps:$4 sm:$0xff]  }
  0x98   :  { %646 = vmatpush1.bf16.msra.mxu0 %v4172_v24  ;;  %v4243_v24 = vld [vmem:[#allocation7 + $0x1ac] ss:$16 sps:$4 sm:$0xff]  }
  0x99   :  { %647 = vmatprep.subr.bf16.mxu0 %v4177_v25  ;;  %v4241_v25 = vld [vmem:[#allocation7 + $0x1a8] ss:$16 sps:$4 sm:$0xff]  }
  0x9c   :  { %648 = vmatpush1.bf16.msra.mxu0 %v4175_v26  ;;  %v4246_v26 = vld [vmem:[#allocation7 + $0x1cc] ss:$16 sps:$4 sm:$0xff]  }
  0x9d   :  { %649 = vmatprep.subr.bf16.mxu0 %v4180_v27  ;;  %v4244_v27 = vld [vmem:[#allocation7 + $0x1c8] ss:$16 sps:$4 sm:$0xff]  }
  0xa0   :  { %650 = vmatpush1.bf16.msra.mxu0 %v4178_v28  ;;  %v4249_v28 = vld [vmem:[#allocation7 + $0x1ec] ss:$16 sps:$4 sm:$0xff]  }
  0xa1   :  { %651 = vmatprep.subr.bf16.mxu0 %v4183_v29  ;;  %v731_v29 = vld [vmem:[#allocation10] sm:$0xff] }
  0xa4   :  { %652 = vmatpush1.bf16.msra.mxu0 %v4181_v30  ;;  %v735_v30 = vld [vmem:[#allocation10 + $0x20] sm:$0xff] }
  0xa5   :  { %653 = vmatprep.subr.bf16.mxu0 %v4186_v31  ;;  %v4247_v31 = vld [vmem:[#allocation7 + $0x1e8] ss:$16 sps:$4 sm:$0xff]  }
  0xa8   :  { %654 = vmatpush1.bf16.msra.mxu0 %v4184_v32  ;;  %v3709_v32 = vcombine.high %v731_v29, %v735_v30 }
  0xa9   :  { %655 = vmatprep.subr.bf16.mxu0 %v4189_v33  ;;  %v739_v33 = vld [vmem:[#allocation10 + $0x40] sm:$0xff] }
  0xac   :  { %656 = vmatpush1.bf16.msra.mxu0 %v4187_v34  ;;  %v743_v34 = vld [vmem:[#allocation10 + $0x60] sm:$0xff] }
  0xad   :  { %657 = vmatprep.subr.bf16.mxu0 %v4192_v35  ;;  %v3708_v35 = vcombine.low %v731_v29, %v735_v30  ;;  %v883_v30 = vld [vmem:[#allocation10 + $0x4c0] sm:$0xff] }
  0xb0   :  { %658 = vmatpush1.bf16.msra.mxu0 %v4190_v36  ;;  %v3717_v36 = vcombine.high %v739_v33, %v743_v34 }
  0xb1   :  { %659 = vmatprep.subr.bf16.mxu0 %v4195_v37  ;;  %v747_v37 = vld [vmem:[#allocation10 + $0x80] sm:$0xff] }
  0xb4   :  { %660 = vmatpush1.bf16.msra.mxu0 %v4193_v38  ;;  %v751_v38 = vld [vmem:[#allocation10 + $0xa0] sm:$0xff] }
  0xb5   :  { %661 = vmatprep.subr.bf16.mxu0 %v4198_v39  ;;  %v3716_v39 = vcombine.low %v739_v33, %v743_v34 }
  0xb8   :  { %662 = vmatpush1.bf16.msra.mxu0 %v4196_v40  ;;  %v3725_v40 = vcombine.high %v747_v37, %v751_v38 }
  0xb9   :  { %663 = vmatprep.subr.bf16.mxu0 %v4201_v41  ;;  %v755_v41 = vld [vmem:[#allocation10 + $0xc0] sm:$0xff] }
  0xbc   :  { %664 = vmatpush1.bf16.msra.mxu0 %v4199_v42  ;;  %v759_v42 = vld [vmem:[#allocation10 + $0xe0] sm:$0xff] }
  0xbd   :  { %674 = vmatprep.subr.bf16.mxu0 %v4204_v43  ;;  %v3724_v43 = vcombine.low %v747_v37, %v751_v38  ;;  %v3733_v44 = vcombine.high %v755_v41, %v759_v42  ;;  %v891_v38 = vld [vmem:[#allocation10 + $0x500] sm:$0xff] }
 0x152   :  { %v212_v51 = vpop.f32.mrb[0].mxu0 }
 0x153   :  { %v213_v52 = vadd.f32 %v212_v51, %v127_v49  ;;  %v214_v53 = vpop.f32.mrb[1].mxu0  ;;  %v767_v49 = vld [vmem:[#allocation10 + $0x120] sm:$0xff] }
 0x154   :  { %v215_v54 = vadd.f32 %v214_v53, %v131_v50  ;;  %v216_v55 = vpop.f32.mrb[2].mxu0  ;;  %v3732_v50 = vcombine.low %v755_v41, %v759_v42  ;;  %v3741_v51 = vcombine.high %v763_v47, %v767_v49  ;;  %v775_v53 = vld [vmem:[#allocation10 + $0x160] sm:$0xff] }
 0x155   :  { %vm219_vm1 = vcmp.gt.f32.partialorder %v213_v52, 0.0  ;;  %v221_v56 = vmul.f32 0.1, %v213_v52  ;;  %v217_v57 = vpop.f32.mrb[3].mxu0 }
 0x156   :  { %vm220_vm2 = vcmp.gt.f32.partialorder %v215_v54, 0.0  ;;  %v222_v58 = vmul.f32 0.1, %v215_v54  ;;  %v783_v57 = vld [vmem:[#allocation10 + $0x1a0] sm:$0xff] }
 0x157   :  { %v223_v59 = vsel %vm219_vm1, %v213_v52, %v221_v56  ;;  %v771_v52 = vld [vmem:[#allocation10 + $0x140] sm:$0xff] }
 0x158   :  { %v224_v60 = vsel %vm220_vm2, %v215_v54, %v222_v58  ;;  %v4765_v63 = vpack.c.bf16 %v223_v59, %v223_v59  ;;  %v3740_v54 = vcombine.low %v763_v47, %v767_v49  ;;  %v3749_v55 = vcombine.high %v771_v52, %v775_v53  ;;  %v779_v56 = vld [vmem:[#allocation10 + $0x180] sm:$0xff] }
 0x159   :  { %v226_v61 = vpack.c.bf16 %v224_v60, %v224_v60  ;;  %v3748_v58 = vcombine.low %v771_v52, %v775_v53  ;;  %v3757_v59 = vcombine.high %v779_v56, %v783_v57  ;;  %v787_v60 = vld [vmem:[#allocation10 + $0x1c0] sm:$0xff] }
 0x15a   :  { %v899_v49 = vld [vmem:[#allocation10 + $0x540] sm:$0xff] }
 0x15b   :  { %665 = vmatprep.mubr.bf16.mxu0 %v226_v61 }
 0x15c   :  { %666 = vmatmul.mubr.bf16.vlgmr.msra.gmra.mrb[4].mxu0 %v4765_v63 }
 0x15d   :  { %675 = vmatpush1.bf16.msra.mxu0 %v4202_v62  ;;  %706 = vmatprep.mubr.bf16.mxu0 %v226_v61  ;;  %v791_v61 = vld [vmem:[#allocation10 + $0x1e0] sm:$0xff]  ;;  %v3756_v62 = vcombine.low %v779_v56, %v783_v57 }
 0x15e   :  { %676 = vmatprep.subr.bf16.mxu0 %v4207_v0  ;;  %v795_v0 = vld [vmem:[#allocation10 + $0x200] sm:$0xff] }
 0x15f   :  { %v907_v57 = vld [vmem:[#allocation10 + $0x580] sm:$0xff] }
 0x161   :  { %677 = vmatpush1.bf16.msra.mxu0 %v4205_v1  ;;  %v799_v1 = vld [vmem:[#allocation10 + $0x220] sm:$0xff] }
 0x162   :  { %678 = vmatprep.subr.bf16.mxu0 %v4210_v2  ;;  %v3764_v2 = vcombine.low %v787_v60, %v791_v61 }
 0x165   :  { %679 = vmatpush1.bf16.msra.mxu0 %v4208_v3  ;;  %v859_v3 = vld [vmem:[#allocation10 + $0x400] sm:$0xff] }
 0x166   :  { %680 = vmatprep.subr.bf16.mxu0 %v4213_v4  ;;  %v863_v4 = vld [vmem:[#allocation10 + $0x420] sm:$0xff] }
 0x169   :  { %681 = vmatpush1.bf16.msra.mxu0 %v4211_v5  ;;  %v3773_v5 = vcombine.high %v795_v0, %v799_v1 }
 0x16a   :  { %682 = vmatprep.subr.bf16.mxu0 %v4216_v6  ;;  %v3837_v6 = vcombine.high %v859_v3, %v863_v4 }
 0x16c   :  { %2350 = vmatprep.subr.bf16.mxu1 %v3837_v6 }
 0x16d   :  { %683 = vmatpush1.bf16.msra.mxu0 %v4214_v7  ;;  %v4769_v7 = vld [vmem:[#allocation10 + $0x8] sm:$0xff] }
 0x16e   :  { %684 = vmatprep.subr.bf16.mxu0 %v4219_v8  ;;  %v4771_v8 = vld [vmem:[#allocation10 + $0x28] sm:$0xff] }
 0x171   :  { %685 = vmatpush1.bf16.msra.mxu0 %v4217_v9  ;;  %v803_v9 = vld [vmem:[#allocation10 + $0x240] sm:$0xff] }
 0x172   :  { %686 = vmatprep.subr.bf16.mxu0 %v4222_v10  ;;  %v807_v10 = vld [vmem:[#allocation10 + $0x260] sm:$0xff] }
 0x175   :  { %687 = vmatpush1.bf16.msra.mxu0 %v4220_v11  ;;  %v3836_v11 = vcombine.low %v859_v3, %v863_v4 }
 0x176   :  { %688 = vmatprep.subr.bf16.mxu0 %v4225_v12  ;;  %v3710_v12 = vcombine.low %v4769_v7, %v4771_v8 }
 0x177   :  { %2351 = vmatpush1.bf16.msra.mxu1 %v3836_v11  ;;  %v3711_v11 = vcombine.high %v4769_v7, %v4771_v8  ;;  %v776_v7 = vld [vmem:[#allocation10 + $0x168] sm:$0xff] }
 0x179   :  { %689 = vmatpush1.bf16.msra.mxu0 %v4223_v13  ;;  %v3772_v13 = vcombine.low %v795_v0, %v799_v1  ;;  %v915_v1 = vld [vmem:[#allocation10 + $0x5c0] sm:$0xff] }
 0x17a   :  { %690 = vmatprep.subr.bf16.mxu0 %v4228_v14  ;;  %v867_v14 = vld [vmem:[#allocation10 + $0x440] sm:$0xff] }
 0x17d   :  { %691 = vmatpush1.bf16.msra.mxu0 %v4226_v15  ;;  %v871_v15 = vld [vmem:[#allocation10 + $0x460] sm:$0xff] }
 0x17e   :  { %692 = vmatprep.subr.bf16.mxu0 %v4231_v16  ;;  %v3781_v16 = vcombine.high %v803_v9, %v807_v10 }
 0x181   :  { %693 = vmatpush1.bf16.msra.mxu0 %v4229_v17  ;;  %v3845_v17 = vcombine.high %v867_v14, %v871_v15 }
 0x182   :  { %694 = vmatprep.subr.bf16.mxu0 %v4234_v18  ;;  %v3844_v18 = vcombine.low %v867_v14, %v871_v15  ;;  %v931_v15 = vld [vmem:[#allocation10 + $0x640] sm:$0xff] }
 0x183   :  { %2352 = vmatprep.subr.bf16.mxu1 %v3845_v17 }
 0x184   :  { %2353 = vmatpush1.bf16.msra.mxu1 %v3844_v18 }
 0x185   :  { %695 = vmatpush1.bf16.msra.mxu0 %v4232_v19  ;;  %v811_v19 = vld [vmem:[#allocation10 + $0x280] sm:$0xff] }
 0x186   :  { %696 = vmatprep.subr.bf16.mxu0 %v4237_v20  ;;  %v815_v20 = vld [vmem:[#allocation10 + $0x2a0] sm:$0xff] }
 0x187   :  { %v3788_v29 = vcombine.low %v811_v19, %v815_v20 }
 0x189   :  { %697 = vmatpush1.bf16.msra.mxu0 %v4235_v21  ;;  %v3780_v21 = vcombine.low %v803_v9, %v807_v10  ;;  %v923_v9 = vld [vmem:[#allocation10 + $0x600] sm:$0xff] }
 0x18a   :  { %698 = vmatprep.subr.bf16.mxu0 %v4240_v22  ;;  %v875_v22 = vld [vmem:[#allocation10 + $0x480] sm:$0xff] }
 0x18b   :  { %v927_v10 = vld [vmem:[#allocation10 + $0x620] sm:$0xff] }
 0x18c   :  { %v3900_v14 = vcombine.low %v923_v9, %v927_v10 }
 0x18d   :  { %699 = vmatpush1.bf16.msra.mxu0 %v4238_v23  ;;  %v879_v23 = vld [vmem:[#allocation10 + $0x4a0] sm:$0xff] }
 0x18e   :  { %700 = vmatprep.subr.bf16.mxu0 %v4243_v24  ;;  %v3789_v24 = vcombine.high %v811_v19, %v815_v20  ;;  %v939_v19 = vld [vmem:[#allocation10 + $0x680] sm:$0xff] }
 0x18f   :  { %v943_v20 = vld [vmem:[#allocation10 + $0x6a0] sm:$0xff] }
 0x191   :  { %701 = vmatpush1.bf16.msra.mxu0 %v4241_v25  ;;  %v3853_v25 = vcombine.high %v875_v22, %v879_v23 }
 0x192   :  { %702 = vmatprep.subr.bf16.mxu0 %v4246_v26  ;;  %v3852_v26 = vcombine.low %v875_v22, %v879_v23  ;;  %v3916_v22 = vcombine.low %v939_v19, %v943_v20  ;;  %v947_v23 = vld [vmem:[#allocation10 + $0x6c0] sm:$0xff] }
 0x193   :  { %2354 = vmatprep.subr.bf16.mxu1 %v3853_v25 }
 0x194   :  { %2355 = vmatpush1.bf16.msra.mxu1 %v3852_v26 }
 0x195   :  { %703 = vmatpush1.bf16.msra.mxu0 %v4244_v27  ;;  %v819_v27 = vld [vmem:[#allocation10 + $0x2c0] sm:$0xff] }
 0x196   :  { %704 = vmatprep.subr.bf16.mxu0 %v4249_v28  ;;  %v823_v28 = vld [vmem:[#allocation10 + $0x2e0] sm:$0xff] }
 0x197   :  { %v3796_v37 = vcombine.low %v819_v27, %v823_v28 }
 0x199   :  { %705 = vmatpush1.bf16.msra.mxu0 %v4247_v31  ;;  %v887_v31 = vld [vmem:[#allocation10 + $0x4e0] sm:$0xff] }
 0x19a   :  { %2309 = vmatprep.subr.bf16.mxu0 %v3709_v32  ;;  %v3797_v32 = vcombine.high %v819_v27, %v823_v28  ;;  %v3861_v33 = vcombine.high %v883_v30, %v887_v31  ;;  %v3860_v34 = vcombine.low %v883_v30, %v887_v31  ;;  %v955_v27 = vld [vmem:[#allocation10 + $0x700] sm:$0xff] }
 0x19b   :  { %v959_v28 = vld [vmem:[#allocation10 + $0x720] sm:$0xff] }
 0x19c   :  { %707 = vmatmul.mubr.bf16.vlgmr.msra.gmra.mrb[8].mxu0 %v4765_v63  ;;  %v3765_v63 = vcombine.high %v787_v60, %v791_v61  ;;  %2356 = vmatprep.subr.bf16.mxu1 %v3861_v33  ;;  %v3932_v30 = vcombine.low %v955_v27, %v959_v28  ;;  %v963_v31 = vld [vmem:[#allocation10 + $0x740] sm:$0xff] }
 0x19d   :  { %2310 = vmatpush1.bf16.msra.mxu0 %v3708_v35  ;;  %v827_v35 = vld [vmem:[#allocation10 + $0x300] sm:$0xff]  ;;  %2357 = vmatpush1.bf16.msra.mxu1 %v3860_v34 }
 0x19e   :  { %2311 = vmatprep.subr.bf16.mxu0 %v3717_v36  ;;  %v831_v36 = vld [vmem:[#allocation10 + $0x320] sm:$0xff] }
 0x19f   :  { %v3804_v47 = vcombine.low %v827_v35, %v831_v36 }
 0x1a1   :  { %2312 = vmatpush1.bf16.msra.mxu0 %v3716_v39  ;;  %v895_v39 = vld [vmem:[#allocation10 + $0x520] sm:$0xff] }
 0x1a2   :  { %2313 = vmatprep.subr.bf16.mxu0 %v3725_v40  ;;  %v3805_v40 = vcombine.high %v827_v35, %v831_v36  ;;  %v3869_v41 = vcombine.high %v891_v38, %v895_v39  ;;  %v3868_v42 = vcombine.low %v891_v38, %v895_v39  ;;  %v971_v35 = vld [vmem:[#allocation10 + $0x780] sm:$0xff] }
 0x1a3   :  { %v975_v36 = vld [vmem:[#allocation10 + $0x7a0] sm:$0xff] }
 0x1a4   :  { %2358 = vmatprep.subr.bf16.mxu1 %v3869_v41  ;;  %v3948_v38 = vcombine.low %v971_v35, %v975_v36  ;;  %v979_v39 = vld [vmem:[#allocation10 + $0x7c0] sm:$0xff] }
 0x1a5   :  { %2314 = vmatpush1.bf16.msra.mxu0 %v3724_v43  ;;  %v835_v43 = vld [vmem:[#allocation10 + $0x340] sm:$0xff]  ;;  %2359 = vmatpush1.bf16.msra.mxu1 %v3868_v42 }
 0x1a6   :  { %2315 = vmatprep.subr.bf16.mxu0 %v3733_v44  ;;  %v839_v44 = vld [vmem:[#allocation10 + $0x360] sm:$0xff] }
 0x1a7   :  { %v3812_v56 = vcombine.low %v835_v43, %v839_v44 }
 0x1a9   :  { %2316 = vmatpush1.bf16.msra.mxu0 %v3732_v50  ;;  %v903_v50 = vld [vmem:[#allocation10 + $0x560] sm:$0xff] }
 0x1aa   :  { %2317 = vmatprep.subr.bf16.mxu0 %v3741_v51  ;;  %v3813_v51 = vcombine.high %v835_v43, %v839_v44  ;;  %v3877_v52 = vcombine.high %v899_v49, %v903_v50  ;;  %v3876_v53 = vcombine.low %v899_v49, %v903_v50  ;;  %v4777_v43 = vld [vmem:[#allocation10 + $0x10] sm:$0xff]  ;;  %v4785_v50 = vld [vmem:[#allocation8] sm:$0xf] }
 0x1ab   :  { %v4779_v44 = vld [vmem:[#allocation10 + $0x30] sm:$0xff] }
 0x1ac   :  { %2360 = vmatprep.subr.bf16.mxu1 %v3877_v52  ;;  %v3712_v49 = vcombine.low %v4777_v43, %v4779_v44  ;;  %v300_v52 = vrot.slane %v4785_v50, %v4761_v48 }
 0x1ad   :  { %2318 = vmatpush1.bf16.msra.mxu0 %v3740_v54  ;;  %v843_v54 = vld [vmem:[#allocation10 + $0x380] sm:$0xff]  ;;  %2361 = vmatpush1.bf16.msra.mxu1 %v3876_v53 }
 0x1ae   :  { %2319 = vmatprep.subr.bf16.mxu0 %v3749_v55  ;;  %v847_v55 = vld [vmem:[#allocation10 + $0x3a0] sm:$0xff] }
 0x1af   :  { %v3820_v0 = vcombine.low %v843_v54, %v847_v55 }
 0x1b1   :  { %2320 = vmatpush1.bf16.msra.mxu0 %v3748_v58  ;;  %v911_v58 = vld [vmem:[#allocation10 + $0x5a0] sm:$0xff] }
 0x1b2   :  { %2321 = vmatprep.subr.bf16.mxu0 %v3757_v59  ;;  %v3821_v59 = vcombine.high %v843_v54, %v847_v55  ;;  %v3885_v60 = vcombine.high %v907_v57, %v911_v58  ;;  %v3884_v61 = vcombine.low %v907_v57, %v911_v58 }
 0x1b4   :  { %2362 = vmatprep.subr.bf16.mxu1 %v3885_v60 }
 0x1b5   :  { %2322 = vmatpush1.bf16.msra.mxu0 %v3756_v62  ;;  %v851_v62 = vld [vmem:[#allocation10 + $0x3c0] sm:$0xff]  ;;  %2363 = vmatpush1.bf16.msra.mxu1 %v3884_v61 }
 0x1b6   :  { %2323 = vmatprep.subr.bf16.mxu0 %v3765_v63  ;;  %v855_v63 = vld [vmem:[#allocation10 + $0x3e0] sm:$0xff] }
 0x1b7   :  { %v3829_v3 = vcombine.high %v851_v62, %v855_v63  ;;  %v3828_v6 = vcombine.low %v851_v62, %v855_v63  ;;  %v740_v62 = vld [vmem:[#allocation10 + $0x48] sm:$0xff] }
 0x1b8   :  { %v744_v63 = vld [vmem:[#allocation10 + $0x68] sm:$0xff] }
 0x1b9   :  { %2324 = vmatpush1.bf16.msra.mxu0 %v3764_v2  ;;  %v919_v2 = vld [vmem:[#allocation10 + $0x5e0] sm:$0xff] }
 0x1ba   :  { %2325 = vmatprep.subr.bf16.mxu0 %v3773_v5  ;;  %v3893_v4 = vcombine.high %v915_v1, %v919_v2  ;;  %v3892_v5 = vcombine.low %v915_v1, %v919_v2 }
 0x1bc   :  { %2364 = vmatprep.subr.bf16.mxu1 %v3893_v4  ;;  %v748_v4 = vld [vmem:[#allocation10 + $0x88] sm:$0xff] }
 0x1bd   :  { %2326 = vmatpush1.bf16.msra.mxu0 %v3772_v13  ;;  %2365 = vmatpush1.bf16.msra.mxu1 %v3892_v5  ;;  %v3901_v13 = vcombine.high %v923_v9, %v927_v10  ;;  %v752_v5 = vld [vmem:[#allocation10 + $0xa8] sm:$0xff] }
 0x1be   :  { %2327 = vmatprep.subr.bf16.mxu0 %v3781_v16  ;;  %v935_v16 = vld [vmem:[#allocation10 + $0x660] sm:$0xff]  ;;  %v3727_v9 = vcombine.high %v748_v4, %v752_v5  ;;  %v756_v10 = vld [vmem:[#allocation10 + $0xc8] sm:$0xff] }
 0x1bf   :  { %2366 = vmatprep.subr.bf16.mxu1 %v3901_v13  ;;  %v3909_v17 = vcombine.high %v931_v15, %v935_v16  ;;  %v3908_v18 = vcombine.low %v931_v15, %v935_v16  ;;  %v3726_v13 = vcombine.low %v748_v4, %v752_v5  ;;  %v764_v15 = vld [vmem:[#allocation10 + $0x108] sm:$0xff] }
 0x1c0   :  { %v768_v16 = vld [vmem:[#allocation10 + $0x128] sm:$0xff] }
 0x1c1   :  { %2328 = vmatpush1.bf16.msra.mxu0 %v3780_v21  ;;  %2367 = vmatpush1.bf16.msra.mxu1 %v3900_v14  ;;  %v3917_v21 = vcombine.high %v939_v19, %v943_v20  ;;  %v772_v19 = vld [vmem:[#allocation10 + $0x148] sm:$0xff]  ;;  %v3742_v8 = vcombine.low %v764_v15, %v768_v16 }
 0x1c2   :  { %2329 = vmatprep.subr.bf16.mxu0 %v3789_v24  ;;  %2368 = vmatprep.subr.bf16.mxu1 %v3909_v17  ;;  %v951_v24 = vld [vmem:[#allocation10 + $0x6e0] sm:$0xff]  ;;  %v780_v20 = vld [vmem:[#allocation10 + $0x188] sm:$0xff] }
 0x1c3   :  { %v3925_v25 = vcombine.high %v947_v23, %v951_v24  ;;  %v3924_v26 = vcombine.low %v947_v23, %v951_v24  ;;  %v788_v24 = vld [vmem:[#allocation10 + $0x1c8] sm:$0xff] }
 0x1c4   :  { %v852_v4 = vld [vmem:[#allocation10 + $0x3c8] sm:$0xff] }
 0x1c5   :  { %2330 = vmatpush1.bf16.msra.mxu0 %v3788_v29  ;;  %2369 = vmatpush1.bf16.msra.mxu1 %v3908_v18  ;;  %v3933_v29 = vcombine.high %v955_v27, %v959_v28  ;;  %v3743_v18 = vcombine.high %v764_v15, %v768_v16  ;;  %v796_v28 = vld [vmem:[#allocation10 + $0x208] sm:$0xff] }
 0x1c6   :  { %2331 = vmatprep.subr.bf16.mxu0 %v3797_v32  ;;  %2370 = vmatprep.subr.bf16.mxu1 %v3917_v21  ;;  %v967_v32 = vld [vmem:[#allocation10 + $0x760] sm:$0xff]  ;;  %v784_v21 = vld [vmem:[#allocation10 + $0x1a8] sm:$0xff] }
 0x1c7   :  { %v3941_v33 = vcombine.high %v963_v31, %v967_v32  ;;  %v3940_v34 = vcombine.low %v963_v31, %v967_v32  ;;  %v3759_v23 = vcombine.high %v780_v20, %v784_v21  ;;  %v804_v32 = vld [vmem:[#allocation10 + $0x248] sm:$0xff] }
 0x1c8   :  { %v856_v5 = vld [vmem:[#allocation10 + $0x3e8] sm:$0xff] }
 0x1c9   :  { %2332 = vmatpush1.bf16.msra.mxu0 %v3796_v37  ;;  %2371 = vmatpush1.bf16.msra.mxu1 %v3916_v22  ;;  %v3949_v37 = vcombine.high %v971_v35, %v975_v36  ;;  %v3750_v22 = vcombine.low %v772_v19, %v776_v7  ;;  %v812_v36 = vld [vmem:[#allocation10 + $0x288] sm:$0xff] }
 0x1ca   :  { %2333 = vmatprep.subr.bf16.mxu0 %v3805_v40  ;;  %2372 = vmatprep.subr.bf16.mxu1 %v3925_v25  ;;  %v983_v40 = vld [vmem:[#allocation10 + $0x7e0] sm:$0xff]  ;;  %v792_v25 = vld [vmem:[#allocation10 + $0x1e8] sm:$0xff] }
 0x1cb   :  { %v3957_v41 = vcombine.high %v979_v39, %v983_v40  ;;  %v3956_v42 = vcombine.low %v979_v39, %v983_v40  ;;  %v3767_v27 = vcombine.high %v788_v24, %v792_v25  ;;  %v820_v40 = vld [vmem:[#allocation10 + $0x2c8] sm:$0xff] }
 0x1cc   :  { %v860_v15 = vld [vmem:[#allocation10 + $0x408] sm:$0xff] }
 0x1cd   :  { %2334 = vmatpush1.bf16.msra.mxu0 %v3804_v47  ;;  %2373 = vmatpush1.bf16.msra.mxu1 %v3924_v26  ;;  %v3713_v47 = vcombine.high %v4777_v43, %v4779_v44  ;;  %v3758_v26 = vcombine.low %v780_v20, %v784_v21  ;;  %v864_v16 = vld [vmem:[#allocation10 + $0x428] sm:$0xff]  ;;  %v741_v21 = vld [vmem:[#allocation10 + $0x50] sm:$0xff] }
 0x1ce   :  { %2335 = vmatprep.subr.bf16.mxu0 %v3813_v51  ;;  %2374 = vmatprep.subr.bf16.mxu1 %v3933_v29  ;;  %v296_v51 = vrot.slane %v4785_v50, %v4755_v46  ;;  %v800_v29 = vld [vmem:[#allocation10 + $0x228] sm:$0xff] }
 0x1cf   :  { %v3775_v31 = vcombine.high %v796_v28, %v800_v29 }
 0x1d1   :  { %2336 = vmatpush1.bf16.msra.mxu0 %v3812_v56  ;;  %2375 = vmatpush1.bf16.msra.mxu1 %v3932_v30  ;;  %v3766_v30 = vcombine.low %v788_v24, %v792_v25  ;;  %v868_v24 = vld [vmem:[#allocation10 + $0x448] sm:$0xff] }
 0x1d2   :  { %2337 = vmatprep.subr.bf16.mxu0 %v3821_v59  ;;  %2376 = vmatprep.subr.bf16.mxu1 %v3941_v33  ;;  %v808_v33 = vld [vmem:[#allocation10 + $0x268] sm:$0xff] }
 0x1d3   :  { %v3783_v35 = vcombine.high %v804_v32, %v808_v33  ;;  %v872_v25 = vld [vmem:[#allocation10 + $0x468] sm:$0xff] }
 0x1d5   :  { %2338 = vmatpush1.bf16.msra.mxu0 %v3820_v0  ;;  %2377 = vmatpush1.bf16.msra.mxu1 %v3940_v34  ;;  %v3774_v34 = vcombine.low %v796_v28, %v800_v29  ;;  %v749_v29 = vld [vmem:[#allocation10 + $0x90] sm:$0xff] }
 0x1d6   :  { %2339 = vmatprep.subr.bf16.mxu0 %v3829_v3  ;;  %2378 = vmatprep.subr.bf16.mxu1 %v3949_v37  ;;  %v3719_v3 = vcombine.high %v740_v62, %v744_v63  ;;  %v816_v37 = vld [vmem:[#allocation10 + $0x2a8] sm:$0xff] }
 0x1d7   :  { %v3791_v39 = vcombine.high %v812_v36, %v816_v37 }
 0x1d9   :  { %2340 = vmatpush1.bf16.msra.mxu0 %v3828_v6  ;;  %2379 = vmatpush1.bf16.msra.mxu1 %v3948_v38  ;;  %v3718_v6 = vcombine.low %v740_v62, %v744_v63  ;;  %v3782_v38 = vcombine.low %v804_v32, %v808_v33  ;;  %v307_v62 = vsub.s32 3, %v4752_v45  ;;  %v753_v32 = vld [vmem:[#allocation10 + $0xb0] sm:$0xff]  ;;  %v876_v33 = vld [vmem:[#allocation10 + $0x488] sm:$0xff] }
 0x1da   :  { %2391 = vmatprep.subr.bf16.mxu0 %v3711_v11  ;;  %2380 = vmatprep.subr.bf16.mxu1 %v3957_v41  ;;  %v760_v11 = vld [vmem:[#allocation10 + $0xe8] sm:$0xff] }
 0x1db   :  { %v3735_v14 = vcombine.high %v756_v10, %v760_v11  ;;  %v3734_v17 = vcombine.low %v756_v10, %v760_v11  ;;  %v824_v41 = vld [vmem:[#allocation10 + $0x2e8] sm:$0xff]  ;;  %v3831_v11 = vcombine.high %v852_v4, %v856_v5 }
 0x1dd   :  { %2381 = vmatpush1.bf16.msra.mxu1 %v3956_v42  ;;  %v3790_v42 = vcombine.low %v812_v36, %v816_v37  ;;  %v3846_v36 = vcombine.low %v868_v24, %v872_v25  ;;  %v3729_v37 = vcombine.high %v749_v29, %v753_v32 }
 0x1de   :  { %2473 = vmatprep.subr.bf16.mxu1 %v3713_v47  ;;  %v3799_v47 = vcombine.high %v820_v40, %v824_v41 }
 0x22f   :  { %v667_v53 = vpop.f32.mrb[4].mxu0 }
 0x230   :  { %v668_v54 = vadd.f32 %v667_v53, %v296_v51  ;;  %v669_v55 = vpop.f32.mrb[5].mxu0  ;;  %v828_v51 = vld [vmem:[#allocation10 + $0x308] sm:$0xff]  ;;  %v3798_v53 = vcombine.low %v820_v40, %v824_v41  ;;  %v761_v40 = vld [vmem:[#allocation10 + $0xf0] sm:$0xff] }
 0x231   :  { %v670_v56 = vadd.f32 %v669_v55, %v300_v52  ;;  %v671_v57 = vpop.f32.mrb[6].mxu0  ;;  %v832_v52 = vld [vmem:[#allocation10 + $0x328] sm:$0xff] }
 0x232   :  { %vm715_vm3 = vcmp.gt.f32.partialorder %v668_v54, 0.0  ;;  %v719_v58 = vmul.f32 0.1, %v668_v54  ;;  %v672_v59 = vpop.f32.mrb[7].mxu0  ;;  %v836_v55 = vld [vmem:[#allocation10 + $0x348] sm:$0xff]  ;;  %v3806_v57 = vcombine.low %v828_v51, %v832_v52 }
 0x233   :  { %vm716_vm4 = vcmp.gt.f32.partialorder %v670_v56, 0.0  ;;  %v720_v60 = vmul.f32 0.1, %v670_v56  ;;  %v303_v59 = vsub.s32 2, %v4752_v45  ;;  %v884_v41 = vld [vmem:[#allocation10 + $0x4c8] sm:$0xff] }
 0x234   :  { %v723_v61 = vsel %vm715_vm3, %v668_v54, %v719_v58  ;;  %v3807_v54 = vcombine.high %v828_v51, %v832_v52  ;;  %v765_v51 = vld [vmem:[#allocation10 + $0x110] sm:$0xff] }
 0x235   :  { %v724_v0 = vsel %vm716_vm4, %v670_v56, %v720_v60  ;;  %v4793_v2 = vpack.c.bf16 %v723_v61, %v723_v61  ;;  %v840_v56 = vld [vmem:[#allocation10 + $0x368] sm:$0xff]  ;;  %v769_v52 = vld [vmem:[#allocation10 + $0x130] sm:$0xff] }
 0x236   :  { %v4791_v1 = vpack.c.bf16 %v724_v0, %v724_v0  ;;  %v3815_v58 = vcombine.high %v836_v55, %v840_v56  ;;  %v844_v60 = vld [vmem:[#allocation10 + $0x388] sm:$0xff]  ;;  %v3814_v63 = vcombine.low %v836_v55, %v840_v56 }
 0x237   :  { %v848_v61 = vld [vmem:[#allocation10 + $0x3a8] sm:$0xff] }
 0x238   :  { %2341 = vmatprep.mubr.bf16.mxu0 %v4791_v1  ;;  %v3823_v0 = vcombine.high %v844_v60, %v848_v61 }
 0x239   :  { %2342 = vmatmul.mubr.bf16.vlgmr.msra.gmra.mrb[12].mxu0 %v4793_v2 }
 0x23a   :  { %2392 = vmatpush1.bf16.msra.mxu0 %v3710_v12  ;;  %2423 = vmatprep.mubr.bf16.mxu0 %v4791_v1  ;;  %v3751_v12 = vcombine.high %v772_v19, %v776_v7 }
 0x23b   :  { %2393 = vmatprep.subr.bf16.mxu0 %v3719_v3  ;;  %v304_v3 = vrot.slane %v4785_v50, %v303_v59 }
 0x23e   :  { %2394 = vmatpush1.bf16.msra.mxu0 %v3718_v6  ;;  %v308_v6 = vrot.slane %v4785_v50, %v307_v62  ;;  %v3839_v50 = vcombine.high %v860_v15, %v864_v16 }
 0x23f   :  { %2395 = vmatprep.subr.bf16.mxu0 %v3727_v9  ;;  %v3822_v9 = vcombine.low %v844_v60, %v848_v61  ;;  %v773_v60 = vld [vmem:[#allocation10 + $0x150] sm:$0xff] }
 0x240   :  { %v777_v61 = vld [vmem:[#allocation10 + $0x170] sm:$0xff] }
 0x242   :  { %2396 = vmatpush1.bf16.msra.mxu0 %v3726_v13 }
 0x243   :  { %2397 = vmatprep.subr.bf16.mxu0 %v3735_v14 }
 0x246   :  { %2398 = vmatpush1.bf16.msra.mxu0 %v3734_v17 }
 0x247   :  { %2399 = vmatprep.subr.bf16.mxu0 %v3743_v18 }
 0x24a   :  { %2400 = vmatpush1.bf16.msra.mxu0 %v3742_v8  ;;  %v3830_v8 = vcombine.low %v852_v4, %v856_v5  ;;  %v3753_v5 = vcombine.high %v773_v60, %v777_v61 }
 0x24b   :  { %2401 = vmatprep.subr.bf16.mxu0 %v3751_v12 }
 0x24e   :  { %2402 = vmatpush1.bf16.msra.mxu0 %v3750_v22 }
 0x24f   :  { %2403 = vmatprep.subr.bf16.mxu0 %v3759_v23  ;;  %v745_v23 = vld [vmem:[#allocation10 + $0x70] sm:$0xff] }
 0x252   :  { %2404 = vmatpush1.bf16.msra.mxu0 %v3758_v26 }
 0x253   :  { %2405 = vmatprep.subr.bf16.mxu0 %v3767_v27  ;;  %v3838_v27 = vcombine.low %v860_v15, %v864_v16 }
 0x256   :  { %2406 = vmatpush1.bf16.msra.mxu0 %v3766_v30  ;;  %v3721_v30 = vcombine.high %v741_v21, %v745_v23 }
 0x257   :  { %2407 = vmatprep.subr.bf16.mxu0 %v3775_v31  ;;  %v3847_v31 = vcombine.high %v868_v24, %v872_v25  ;;  %v924_v24 = vld [vmem:[#allocation10 + $0x608] sm:$0xff] }
 0x258   :  { %v928_v25 = vld [vmem:[#allocation10 + $0x628] sm:$0xff] }
 0x25a   :  { %2408 = vmatpush1.bf16.msra.mxu0 %v3774_v34  ;;  %v880_v34 = vld [vmem:[#allocation10 + $0x4a8] sm:$0xff] }
 0x25b   :  { %2409 = vmatprep.subr.bf16.mxu0 %v3783_v35  ;;  %v3720_v35 = vcombine.low %v741_v21, %v745_v23  ;;  %v3854_v43 = vcombine.low %v876_v33, %v880_v34  ;;  %v801_v23 = vld [vmem:[#allocation10 + $0x230] sm:$0xff] }
 0x25e   :  { %2410 = vmatpush1.bf16.msra.mxu0 %v3782_v38  ;;  %v3855_v38 = vcombine.high %v876_v33, %v880_v34  ;;  %v809_v33 = vld [vmem:[#allocation10 + $0x270] sm:$0xff]  ;;  %v932_v34 = vld [vmem:[#allocation10 + $0x648] sm:$0xff] }
 0x25f   :  { %2411 = vmatprep.subr.bf16.mxu0 %v3791_v39  ;;  %v757_v39 = vld [vmem:[#allocation10 + $0xd0] sm:$0xff] }
 0x260   :  { %v3737_v44 = vcombine.high %v757_v39, %v761_v40  ;;  %v3736_v55 = vcombine.low %v757_v39, %v761_v40  ;;  %v813_v40 = vld [vmem:[#allocation10 + $0x290] sm:$0xff] }
 0x262   :  { %2412 = vmatpush1.bf16.msra.mxu0 %v3790_v42  ;;  %v888_v42 = vld [vmem:[#allocation10 + $0x4e8] sm:$0xff] }
 0x263   :  { %2413 = vmatprep.subr.bf16.mxu0 %v3799_v47  ;;  %v3728_v47 = vcombine.low %v749_v29, %v753_v32  ;;  %v3862_v56 = vcombine.low %v884_v41, %v888_v42  ;;  %v805_v32 = vld [vmem:[#allocation10 + $0x250] sm:$0xff] }
 0x266   :  { %2414 = vmatpush1.bf16.msra.mxu0 %v3798_v53  ;;  %v892_v53 = vld [vmem:[#allocation10 + $0x508] sm:$0xff] }
 0x267   :  { %2415 = vmatprep.subr.bf16.mxu0 %v3807_v54  ;;  %v896_v54 = vld [vmem:[#allocation10 + $0x528] sm:$0xff] }
 0x268   :  { %v3870_v4 = vcombine.low %v892_v53, %v896_v54 }
 0x26a   :  { %2416 = vmatpush1.bf16.msra.mxu0 %v3806_v57  ;;  %v3745_v57 = vcombine.high %v765_v51, %v769_v52 }
 0x26b   :  { %2417 = vmatprep.subr.bf16.mxu0 %v3815_v58  ;;  %v3871_v58 = vcombine.high %v892_v53, %v896_v54  ;;  %v825_v53 = vld [vmem:[#allocation10 + $0x2f0] sm:$0xff]  ;;  %v948_v54 = vld [vmem:[#allocation10 + $0x6c8] sm:$0xff] }
 0x26e   :  { %2418 = vmatpush1.bf16.msra.mxu0 %v3814_v63  ;;  %v900_v63 = vld [vmem:[#allocation10 + $0x548] sm:$0xff] }
 0x26f   :  { %v708_v10 = vpop.f32.mrb[8].mxu0  ;;  %2419 = vmatprep.subr.bf16.mxu0 %v3823_v0  ;;  %v904_v0 = vld [vmem:[#allocation10 + $0x568] sm:$0xff] }
 0x270   :  { %v709_v13 = vadd.f32 %v708_v10, %v304_v3  ;;  %v710_v14 = vpop.f32.mrb[9].mxu0  ;;  %v3744_v3 = vcombine.low %v765_v51, %v769_v52  ;;  %v785_v10 = vld [vmem:[#allocation10 + $0x1b0] sm:$0xff]  ;;  %v3878_v15 = vcombine.low %v900_v63, %v904_v0 }
 0x271   :  { %v711_v17 = vadd.f32 %v710_v14, %v308_v6  ;;  %v712_v18 = vpop.f32.mrb[10].mxu0  ;;  %v3879_v6 = vcombine.high %v900_v63, %v904_v0  ;;  %v3752_v14 = vcombine.low %v773_v60, %v777_v61  ;;  %v821_v52 = vld [vmem:[#allocation10 + $0x2d0] sm:$0xff]  ;;  %v956_v0 = vld [vmem:[#allocation10 + $0x708] sm:$0xff] }
 0x272   :  { %vm717_vm5 = vcmp.gt.f32.partialorder %v709_v13, 0.0  ;;  %v721_v19 = vmul.f32 0.1, %v709_v13  ;;  %v713_v7 = vpop.f32.mrb[11].mxu0  ;;  %2420 = vmatpush1.bf16.msra.mxu0 %v3822_v9  ;;  %v781_v9 = vld [vmem:[#allocation10 + $0x190] sm:$0xff] }
 0x273   :  { %vm718_vm6 = vcmp.gt.f32.partialorder %v711_v17, 0.0  ;;  %v722_v12 = vmul.f32 0.1, %v711_v17  ;;  %2421 = vmatprep.subr.bf16.mxu0 %v3831_v11  ;;  %v908_v11 = vld [vmem:[#allocation10 + $0x588] sm:$0xff]  ;;  %v3761_v16 = vcombine.high %v781_v9, %v785_v10  ;;  %v789_v18 = vld [vmem:[#allocation10 + $0x1d0] sm:$0xff] }
 0x274   :  { %v725_v20 = vsel %vm717_vm5, %v709_v13, %v721_v19  ;;  %v912_v13 = vld [vmem:[#allocation10 + $0x5a8] sm:$0xff]  ;;  %v793_v19 = vld [vmem:[#allocation10 + $0x1f0] sm:$0xff] }
 0x275   :  { %v726_v22 = vsel %vm718_vm6, %v711_v17, %v722_v12  ;;  %v4811_v28 = vpack.c.bf16 %v725_v20, %v725_v20  ;;  %v3887_v17 = vcombine.high %v908_v11, %v912_v13  ;;  %v916_v7 = vld [vmem:[#allocation10 + $0x5c8] sm:$0xff]  ;;  %v3760_v12 = vcombine.low %v781_v9, %v785_v10  ;;  %v829_v61 = vld [vmem:[#allocation10 + $0x310] sm:$0xff] }
 0x276   :  { %v4809_v26 = vpack.c.bf16 %v726_v22, %v726_v22  ;;  %2422 = vmatpush1.bf16.msra.mxu0 %v3830_v8  ;;  %v920_v8 = vld [vmem:[#allocation10 + $0x5e8] sm:$0xff]  ;;  %v3769_v20 = vcombine.high %v789_v18, %v793_v19  ;;  %v797_v22 = vld [vmem:[#allocation10 + $0x210] sm:$0xff] }
 0x277   :  { %2432 = vmatprep.subr.bf16.mxu0 %v3839_v50  ;;  %v3886_v50 = vcombine.low %v908_v11, %v912_v13  ;;  %v3895_v21 = vcombine.high %v916_v7, %v920_v8  ;;  %v3894_v29 = vcombine.low %v916_v7, %v920_v8  ;;  %v833_v63 = vld [vmem:[#allocation10 + $0x330] sm:$0xff]  ;;  %v964_v13 = vld [vmem:[#allocation10 + $0x748] sm:$0xff] }
 0x278   :  { %2382 = vmatprep.mubr.bf16.mxu1 %v4809_v26  ;;  %v837_v10 = vld [vmem:[#allocation10 + $0x350] sm:$0xff]  ;;  %v972_v8 = vld [vmem:[#allocation10 + $0x788] sm:$0xff] }
 0x279   :  { %2383 = vmatmul.mubr.bf16.vlgmr.msra.gmra.mrb[0].mxu1 %v4811_v28  ;;  %2424 = vmatmul.mubr.bf16.vlgmr.msra.gmra.mrb[16].mxu0 %v4793_v2  ;;  %v841_v11 = vld [vmem:[#allocation10 + $0x370] sm:$0xff] }
 0x27a   :  { %2474 = vmatpush1.bf16.msra.mxu1 %v3712_v49  ;;  %2433 = vmatpush1.bf16.msra.mxu0 %v3838_v27  ;;  %v3863_v49 = vcombine.high %v884_v41, %v888_v42  ;;  %v3768_v27 = vcombine.low %v789_v18, %v793_v19  ;;  %v817_v41 = vld [vmem:[#allocation10 + $0x2b0] sm:$0xff]  ;;  %v940_v42 = vld [vmem:[#allocation10 + $0x688] sm:$0xff] }
 0x27b   :  { %2464 = vmatprep.mubr.bf16.mxu0 %v4809_v26  ;;  %2505 = vmatprep.mubr.bf16.mxu1 %v4791_v1  ;;  %v845_v19 = vld [vmem:[#allocation10 + $0x390] sm:$0xff] }
 0x27c   :  { %2475 = vmatprep.subr.bf16.mxu1 %v3721_v30  ;;  %2434 = vmatprep.subr.bf16.mxu0 %v3847_v31  ;;  %v3777_v30 = vcombine.high %v797_v22, %v801_v23  ;;  %v3903_v31 = vcombine.high %v924_v24, %v928_v25  ;;  %v849_v7 = vld [vmem:[#allocation10 + $0x3b0] sm:$0xff] }
 0x27e   :  { %2476 = vmatpush1.bf16.msra.mxu1 %v3720_v35  ;;  %2435 = vmatpush1.bf16.msra.mxu0 %v3846_v36  ;;  %v936_v35 = vld [vmem:[#allocation10 + $0x668] sm:$0xff]  ;;  %v3776_v36 = vcombine.low %v797_v22, %v801_v23  ;;  %v853_v23 = vld [vmem:[#allocation10 + $0x3d0] sm:$0xff] }
 0x27f   :  { %2477 = vmatprep.subr.bf16.mxu1 %v3729_v37  ;;  %2436 = vmatprep.subr.bf16.mxu0 %v3855_v38  ;;  %v3902_v37 = vcombine.low %v924_v24, %v928_v25  ;;  %v3785_v38 = vcombine.high %v805_v32, %v809_v33  ;;  %v3911_v39 = vcombine.high %v932_v34, %v936_v35  ;;  %v857_v24 = vld [vmem:[#allocation10 + $0x3f0] sm:$0xff]  ;;  %v980_v25 = vld [vmem:[#allocation10 + $0x7c8] sm:$0xff] }
 0x282   :  { %2478 = vmatpush1.bf16.msra.mxu1 %v3728_v47  ;;  %2437 = vmatpush1.bf16.msra.mxu0 %v3854_v43  ;;  %v944_v47 = vld [vmem:[#allocation10 + $0x6a8] sm:$0xff]  ;;  %v3784_v43 = vcombine.low %v805_v32, %v809_v33  ;;  %v861_v33 = vld [vmem:[#allocation10 + $0x410] sm:$0xff] }
 0x283   :  { %2479 = vmatprep.subr.bf16.mxu1 %v3737_v44  ;;  %2438 = vmatprep.subr.bf16.mxu0 %v3863_v49  ;;  %v3910_v44 = vcombine.low %v932_v34, %v936_v35  ;;  %v3793_v49 = vcombine.high %v813_v40, %v817_v41  ;;  %v3919_v51 = vcombine.high %v940_v42, %v944_v47  ;;  %v865_v34 = vld [vmem:[#allocation10 + $0x430] sm:$0xff]  ;;  %v734_v35 = vld [vmem:[#allocation10 + $0x18] sm:$0xff] }
 0x286   :  { %2480 = vmatpush1.bf16.msra.mxu1 %v3736_v55  ;;  %2439 = vmatpush1.bf16.msra.mxu0 %v3862_v56  ;;  %v952_v55 = vld [vmem:[#allocation10 + $0x6e8] sm:$0xff]  ;;  %v3792_v56 = vcombine.low %v813_v40, %v817_v41  ;;  %v869_v41 = vld [vmem:[#allocation10 + $0x450] sm:$0xff] }
 0x287   :  { %2481 = vmatprep.subr.bf16.mxu1 %v3745_v57  ;;  %2440 = vmatprep.subr.bf16.mxu0 %v3871_v58  ;;  %v3918_v57 = vcombine.low %v940_v42, %v944_v47  ;;  %v3801_v58 = vcombine.high %v821_v52, %v825_v53  ;;  %v3927_v60 = vcombine.high %v948_v54, %v952_v55  ;;  %v873_v42 = vld [vmem:[#allocation10 + $0x470] sm:$0xff]  ;;  %v742_v47 = vld [vmem:[#allocation10 + $0x58] sm:$0xff] }
 0x28a   :  { %2482 = vmatpush1.bf16.msra.mxu1 %v3744_v3  ;;  %2441 = vmatpush1.bf16.msra.mxu0 %v3870_v4  ;;  %v960_v3 = vld [vmem:[#allocation10 + $0x728] sm:$0xff]  ;;  %v3800_v4 = vcombine.low %v821_v52, %v825_v53  ;;  %v877_v53 = vld [vmem:[#allocation10 + $0x490] sm:$0xff] }
 0x28b   :  { %2483 = vmatprep.subr.bf16.mxu1 %v3753_v5  ;;  %2442 = vmatprep.subr.bf16.mxu0 %v3879_v6  ;;  %v3926_v5 = vcombine.low %v948_v54, %v952_v55  ;;  %v3809_v6 = vcombine.high %v829_v61, %v833_v63  ;;  %v3935_v9 = vcombine.high %v956_v0, %v960_v3  ;;  %v881_v54 = vld [vmem:[#allocation10 + $0x4b0] sm:$0xff]  ;;  %v750_v55 = vld [vmem:[#allocation10 + $0x98] sm:$0xff] }
 0x28e   :  { %2484 = vmatpush1.bf16.msra.mxu1 %v3752_v14  ;;  %2443 = vmatpush1.bf16.msra.mxu0 %v3878_v15  ;;  %v968_v14 = vld [vmem:[#allocation10 + $0x768] sm:$0xff]  ;;  %v3808_v15 = vcombine.low %v829_v61, %v833_v63  ;;  %v885_v63 = vld [vmem:[#allocation10 + $0x4d0] sm:$0xff] }
 0x28f   :  { %2485 = vmatprep.subr.bf16.mxu1 %v3761_v16  ;;  %2444 = vmatprep.subr.bf16.mxu0 %v3887_v17  ;;  %v3934_v16 = vcombine.low %v956_v0, %v960_v3  ;;  %v3817_v17 = vcombine.high %v837_v10, %v841_v11  ;;  %v3943_v18 = vcombine.high %v964_v13, %v968_v14  ;;  %v889_v0 = vld [vmem:[#allocation10 + $0x4f0] sm:$0xff]  ;;  %v758_v3 = vld [vmem:[#allocation10 + $0xd8] sm:$0xff] }
 0x292   :  { %2486 = vmatpush1.bf16.msra.mxu1 %v3760_v12  ;;  %2445 = vmatpush1.bf16.msra.mxu0 %v3886_v50  ;;  %v976_v12 = vld [vmem:[#allocation10 + $0x7a8] sm:$0xff]  ;;  %v3816_v50 = vcombine.low %v837_v10, %v841_v11  ;;  %v893_v11 = vld [vmem:[#allocation10 + $0x510] sm:$0xff] }
 0x293   :  { %2487 = vmatprep.subr.bf16.mxu1 %v3769_v20  ;;  %2446 = vmatprep.subr.bf16.mxu0 %v3895_v21  ;;  %v3942_v20 = vcombine.low %v964_v13, %v968_v14  ;;  %v3825_v21 = vcombine.high %v845_v19, %v849_v7  ;;  %v3951_v22 = vcombine.high %v972_v8, %v976_v12  ;;  %v897_v13 = vld [vmem:[#allocation10 + $0x530] sm:$0xff]  ;;  %v770_v14 = vld [vmem:[#allocation10 + $0x138] sm:$0xff] }
 0x296   :  { %2488 = vmatpush1.bf16.msra.mxu1 %v3768_v27  ;;  %2447 = vmatpush1.bf16.msra.mxu0 %v3894_v29  ;;  %v984_v27 = vld [vmem:[#allocation10 + $0x7e8] sm:$0xff]  ;;  %v3824_v29 = vcombine.low %v845_v19, %v849_v7  ;;  %v901_v19 = vld [vmem:[#allocation10 + $0x550] sm:$0xff] }
 0x297   :  { %2489 = vmatprep.subr.bf16.mxu1 %v3777_v30  ;;  %2448 = vmatprep.subr.bf16.mxu0 %v3903_v31  ;;  %v3950_v30 = vcombine.low %v972_v8, %v976_v12  ;;  %v3833_v31 = vcombine.high %v853_v23, %v857_v24  ;;  %v3959_v32 = vcombine.high %v980_v25, %v984_v27  ;;  %v905_v7 = vld [vmem:[#allocation10 + $0x570] sm:$0xff]  ;;  %v774_v8 = vld [vmem:[#allocation10 + $0x158] sm:$0xff] }
 0x298   :  { %v778_v12 = vld [vmem:[#allocation10 + $0x178] sm:$0xff] }
 0x29a   :  { %2490 = vmatpush1.bf16.msra.mxu1 %v3776_v36  ;;  %2449 = vmatpush1.bf16.msra.mxu0 %v3902_v37  ;;  %v738_v36 = vld [vmem:[#allocation10 + $0x38] sm:$0xff]  ;;  %v3832_v37 = vcombine.low %v853_v23, %v857_v24  ;;  %v909_v23 = vld [vmem:[#allocation10 + $0x590] sm:$0xff] }
 0x29b   :  { %2491 = vmatprep.subr.bf16.mxu1 %v3785_v38  ;;  %2450 = vmatprep.subr.bf16.mxu0 %v3911_v39  ;;  %v3958_v38 = vcombine.low %v980_v25, %v984_v27  ;;  %v3841_v39 = vcombine.high %v861_v33, %v865_v34  ;;  %v3715_v40 = vcombine.high %v734_v35, %v738_v36  ;;  %v913_v24 = vld [vmem:[#allocation10 + $0x5b0] sm:$0xff]  ;;  %v782_v25 = vld [vmem:[#allocation10 + $0x198] sm:$0xff] }
 0x29c   :  { %v786_v27 = vld [vmem:[#allocation10 + $0x1b8] sm:$0xff] }
 0x29e   :  { %2492 = vmatpush1.bf16.msra.mxu1 %v3784_v43  ;;  %2451 = vmatpush1.bf16.msra.mxu0 %v3910_v44  ;;  %v746_v43 = vld [vmem:[#allocation10 + $0x78] sm:$0xff]  ;;  %v3840_v44 = vcombine.low %v861_v33, %v865_v34  ;;  %v917_v33 = vld [vmem:[#allocation10 + $0x5d0] sm:$0xff] }
 0x29f   :  { %2493 = vmatprep.subr.bf16.mxu1 %v3793_v49  ;;  %2452 = vmatprep.subr.bf16.mxu0 %v3919_v51  ;;  %v3714_v49 = vcombine.low %v734_v35, %v738_v36  ;;  %v3849_v51 = vcombine.high %v869_v41, %v873_v42  ;;  %v3723_v52 = vcombine.high %v742_v47, %v746_v43  ;;  %v921_v34 = vld [vmem:[#allocation10 + $0x5f0] sm:$0xff]  ;;  %v790_v35 = vld [vmem:[#allocation10 + $0x1d8] sm:$0xff] }
 0x2a0   :  { %v794_v36 = vld [vmem:[#allocation10 + $0x1f8] sm:$0xff] }
 0x2a2   :  { %2494 = vmatpush1.bf16.msra.mxu1 %v3792_v56  ;;  %2453 = vmatpush1.bf16.msra.mxu0 %v3918_v57  ;;  %v754_v56 = vld [vmem:[#allocation10 + $0xb8] sm:$0xff]  ;;  %v3848_v57 = vcombine.low %v869_v41, %v873_v42  ;;  %v925_v41 = vld [vmem:[#allocation10 + $0x610] sm:$0xff] }
 0x2a3   :  { %2495 = vmatprep.subr.bf16.mxu1 %v3801_v58  ;;  %2454 = vmatprep.subr.bf16.mxu0 %v3927_v60  ;;  %v3722_v58 = vcombine.low %v742_v47, %v746_v43  ;;  %v3857_v60 = vcombine.high %v877_v53, %v881_v54  ;;  %v3731_v61 = vcombine.high %v750_v55, %v754_v56  ;;  %v929_v42 = vld [vmem:[#allocation10 + $0x630] sm:$0xff]  ;;  %v798_v47 = vld [vmem:[#allocation10 + $0x218] sm:$0xff] }
 0x2a4   :  { %v802_v43 = vld [vmem:[#allocation10 + $0x238] sm:$0xff] }
 0x2a6   :  { %2496 = vmatpush1.bf16.msra.mxu1 %v3800_v4  ;;  %2455 = vmatpush1.bf16.msra.mxu0 %v3926_v5  ;;  %v762_v4 = vld [vmem:[#allocation10 + $0xf8] sm:$0xff]  ;;  %v3856_v5 = vcombine.low %v877_v53, %v881_v54  ;;  %v933_v53 = vld [vmem:[#allocation10 + $0x650] sm:$0xff] }
 0x2a7   :  { %2497 = vmatprep.subr.bf16.mxu1 %v3809_v6  ;;  %2456 = vmatprep.subr.bf16.mxu0 %v3935_v9  ;;  %v3730_v6 = vcombine.low %v750_v55, %v754_v56  ;;  %v3865_v9 = vcombine.high %v885_v63, %v889_v0  ;;  %v3739_v10 = vcombine.high %v758_v3, %v762_v4  ;;  %v937_v54 = vld [vmem:[#allocation10 + $0x670] sm:$0xff]  ;;  %v806_v55 = vld [vmem:[#allocation10 + $0x258] sm:$0xff] }
 0x2a8   :  { %v810_v56 = vld [vmem:[#allocation10 + $0x278] sm:$0xff] }
 0x2aa   :  { %2498 = vmatpush1.bf16.msra.mxu1 %v3808_v15  ;;  %2457 = vmatpush1.bf16.msra.mxu0 %v3934_v16  ;;  %v3864_v15 = vcombine.low %v885_v63, %v889_v0  ;;  %v3738_v16 = vcombine.low %v758_v3, %v762_v4  ;;  %v941_v63 = vld [vmem:[#allocation10 + $0x690] sm:$0xff]  ;;  %v814_v3 = vld [vmem:[#allocation10 + $0x298] sm:$0xff] }
 0x2ab   :  { %2499 = vmatprep.subr.bf16.mxu1 %v3817_v17  ;;  %2458 = vmatprep.subr.bf16.mxu0 %v3943_v18  ;;  %v3873_v17 = vcombine.high %v893_v11, %v897_v13  ;;  %v945_v0 = vld [vmem:[#allocation10 + $0x6b0] sm:$0xff]  ;;  %v818_v4 = vld [vmem:[#allocation10 + $0x2b8] sm:$0xff] }
 0x2ae   :  { %2500 = vmatpush1.bf16.msra.mxu1 %v3816_v50  ;;  %2459 = vmatpush1.bf16.msra.mxu0 %v3942_v20  ;;  %v3872_v50 = vcombine.low %v893_v11, %v897_v13  ;;  %v949_v11 = vld [vmem:[#allocation10 + $0x6d0] sm:$0xff] }
 0x2af   :  { %2501 = vmatprep.subr.bf16.mxu1 %v3825_v21  ;;  %2460 = vmatprep.subr.bf16.mxu0 %v3951_v22  ;;  %v3881_v21 = vcombine.high %v901_v19, %v905_v7  ;;  %v3755_v22 = vcombine.high %v774_v8, %v778_v12  ;;  %v953_v13 = vld [vmem:[#allocation10 + $0x6f0] sm:$0xff] }
 0x2b2   :  { %2502 = vmatpush1.bf16.msra.mxu1 %v3824_v29  ;;  %2461 = vmatpush1.bf16.msra.mxu0 %v3950_v30  ;;  %v3880_v29 = vcombine.low %v901_v19, %v905_v7  ;;  %v3754_v30 = vcombine.low %v774_v8, %v778_v12  ;;  %v957_v19 = vld [vmem:[#allocation10 + $0x710] sm:$0xff]  ;;  %v830_v8 = vld [vmem:[#allocation10 + $0x318] sm:$0xff] }
 0x2b3   :  { %2503 = vmatprep.subr.bf16.mxu1 %v3833_v31  ;;  %2462 = vmatprep.subr.bf16.mxu0 %v3959_v32  ;;  %v3889_v31 = vcombine.high %v909_v23, %v913_v24  ;;  %v3763_v32 = vcombine.high %v782_v25, %v786_v27  ;;  %v961_v7 = vld [vmem:[#allocation10 + $0x730] sm:$0xff]  ;;  %v834_v12 = vld [vmem:[#allocation10 + $0x338] sm:$0xff] }
 0x2b6   :  { %2504 = vmatpush1.bf16.msra.mxu1 %v3832_v37  ;;  %2463 = vmatpush1.bf16.msra.mxu0 %v3958_v38  ;;  %v3888_v37 = vcombine.low %v909_v23, %v913_v24  ;;  %v3762_v38 = vcombine.low %v782_v25, %v786_v27  ;;  %v965_v23 = vld [vmem:[#allocation10 + $0x750] sm:$0xff]  ;;  %v838_v25 = vld [vmem:[#allocation10 + $0x358] sm:$0xff] }
 0x2b7   :  { %2514 = vmatprep.subr.bf16.mxu1 %v3841_v39  ;;  %2555 = vmatprep.subr.bf16.mxu0 %v3715_v40  ;;  %v3897_v39 = vcombine.high %v917_v33, %v921_v34  ;;  %v3771_v40 = vcombine.high %v790_v35, %v794_v36  ;;  %v969_v24 = vld [vmem:[#allocation10 + $0x770] sm:$0xff]  ;;  %v842_v27 = vld [vmem:[#allocation10 + $0x378] sm:$0xff] }
 0x2b9   :  { %2506 = vmatmul.mubr.bf16.vlgmr.msra.gmra.mrb[4].mxu1 %v4793_v2  ;;  %2465 = vmatmul.mubr.bf16.vlgmr.msra.gmra.mrb[16].mxu0 %v4811_v28 }
 0x2ba   :  { %2515 = vmatpush1.bf16.msra.mxu1 %v3840_v44  ;;  %2546 = vmatprep.mubr.bf16.mxu1 %v4809_v26  ;;  %v3896_v44 = vcombine.low %v917_v33, %v921_v34  ;;  %v973_v33 = vld [vmem:[#allocation10 + $0x790] sm:$0xff] }
 0x2bb   :  { %2556 = vmatpush1.bf16.msra.mxu0 %v3714_v49  ;;  %2587 = vmatprep.mubr.bf16.mxu0 %v4791_v1  ;;  %v766_v1 = vld [vmem:[#allocation10 + $0x118] sm:$0xff]  ;;  %v3770_v49 = vcombine.low %v790_v35, %v794_v36  ;;  %v977_v34 = vld [vmem:[#allocation10 + $0x7b0] sm:$0xff] }
 0x2bc   :  { %2516 = vmatprep.subr.bf16.mxu1 %v3849_v51  ;;  %2557 = vmatprep.subr.bf16.mxu0 %v3723_v52  ;;  %v3747_v18 = vcombine.high %v766_v1, %v770_v14  ;;  %v3746_v20 = vcombine.low %v766_v1, %v770_v14  ;;  %v3905_v51 = vcombine.high %v925_v41, %v929_v42  ;;  %v822_v1 = vld [vmem:[#allocation10 + $0x2d8] sm:$0xff] }
 0x2bd   :  { %v3779_v52 = vcombine.high %v798_v47, %v802_v43  ;;  %v826_v14 = vld [vmem:[#allocation10 + $0x2f8] sm:$0xff] }
 0x2be   :  { %2517 = vmatpush1.bf16.msra.mxu1 %v3848_v57  ;;  %v3904_v57 = vcombine.low %v925_v41, %v929_v42  ;;  %v846_v35 = vld [vmem:[#allocation10 + $0x398] sm:$0xff]  ;;  %v981_v41 = vld [vmem:[#allocation10 + $0x7d0] sm:$0xff] }
 0x2bf   :  { %2558 = vmatpush1.bf16.msra.mxu0 %v3722_v58  ;;  %2518 = vmatprep.subr.bf16.mxu1 %v3857_v60  ;;  %v3778_v58 = vcombine.low %v798_v47, %v802_v43  ;;  %v3913_v60 = vcombine.high %v933_v53, %v937_v54  ;;  %v850_v36 = vld [vmem:[#allocation10 + $0x3b8] sm:$0xff]  ;;  %v985_v42 = vld [vmem:[#allocation10 + $0x7f0] sm:$0xff] }
 0x2c0   :  { %2559 = vmatprep.subr.bf16.mxu0 %v3731_v61  ;;  %v3787_v61 = vcombine.high %v806_v55, %v810_v56  ;;  %v854_v47 = vld [vmem:[#allocation10 + $0x3d8] sm:$0xff] }
 0x2c1   :  { %v858_v43 = vld [vmem:[#allocation10 + $0x3f8] sm:$0xff] }
 0x2c2   :  { %2519 = vmatpush1.bf16.msra.mxu1 %v3856_v5  ;;  %v3912_v5 = vcombine.low %v933_v53, %v937_v54  ;;  %v862_v53 = vld [vmem:[#allocation10 + $0x418] sm:$0xff] }
 0x2c3   :  { %2560 = vmatpush1.bf16.msra.mxu0 %v3730_v6  ;;  %2520 = vmatprep.subr.bf16.mxu1 %v3865_v9  ;;  %v3786_v6 = vcombine.low %v806_v55, %v810_v56  ;;  %v3921_v9 = vcombine.high %v941_v63, %v945_v0  ;;  %v866_v54 = vld [vmem:[#allocation10 + $0x438] sm:$0xff]  ;;  %v3960_v55 = vcombine.low %v981_v41, %v985_v42 }
 0x2c4   :  { %2561 = vmatprep.subr.bf16.mxu0 %v3739_v10  ;;  %v3795_v10 = vcombine.high %v814_v3, %v818_v4  ;;  %v3834_v56 = vcombine.low %v854_v47, %v858_v43 }
 0x2c6   :  { %2521 = vmatpush1.bf16.msra.mxu1 %v3864_v15  ;;  %v3920_v15 = vcombine.low %v941_v63, %v945_v0  ;;  %v4250_v63 = vld [vmem:[#allocation11] ss:$8 sps:$4 sm:$0xff]   ;;  %v3842_v0 = vcombine.low %v862_v53, %v866_v54 }
 0x2c7   :  { %2562 = vmatpush1.bf16.msra.mxu0 %v3738_v16  ;;  %2522 = vmatprep.subr.bf16.mxu1 %v3873_v17  ;;  %v3794_v16 = vcombine.low %v814_v3, %v818_v4  ;;  %v3929_v17 = vcombine.high %v949_v11, %v953_v13  ;;  %v4255_v4 = vld [vmem:[#allocation11 + $0x14] ss:$8 sps:$4 sm:$0xff]  }
 0x2c8   :  { %2563 = vmatprep.subr.bf16.mxu0 %v3747_v18  ;;  %v3803_v18 = vcombine.high %v822_v1, %v826_v14 }
 0x2ca   :  { %2523 = vmatpush1.bf16.msra.mxu1 %v3872_v50  ;;  %v3928_v50 = vcombine.low %v949_v11, %v953_v13  ;;  %v4258_v11 = vld [vmem:[#allocation11 + $0x24] ss:$8 sps:$4 sm:$0xff]  }
 0x2cb   :  { %2564 = vmatpush1.bf16.msra.mxu0 %v3746_v20  ;;  %2524 = vmatprep.subr.bf16.mxu1 %v3881_v21  ;;  %v3802_v20 = vcombine.low %v822_v1, %v826_v14  ;;  %v3937_v21 = vcombine.high %v957_v19, %v961_v7  ;;  %v886_v1 = vld [vmem:[#allocation10 + $0x4d8] sm:$0xff] }
 0x2cc   :  { %2565 = vmatprep.subr.bf16.mxu0 %v3755_v22  ;;  %v3811_v22 = vcombine.high %v830_v8, %v834_v12  ;;  %v890_v14 = vld [vmem:[#allocation10 + $0x4f8] sm:$0xff] }
 0x2ce   :  { %2525 = vmatpush1.bf16.msra.mxu1 %v3880_v29  ;;  %v3936_v29 = vcombine.low %v957_v19, %v961_v7  ;;  %v898_v19 = vld [vmem:[#allocation10 + $0x538] sm:$0xff] }
 0x2cf   :  { %2566 = vmatpush1.bf16.msra.mxu0 %v3754_v30  ;;  %2526 = vmatprep.subr.bf16.mxu1 %v3889_v31  ;;  %v3810_v30 = vcombine.low %v830_v8, %v834_v12  ;;  %v3945_v31 = vcombine.high %v965_v23, %v969_v24  ;;  %v4259_v7 = vld [vmem:[#allocation11 + $0x30] ss:$8 sps:$4 sm:$0xff]   ;;  %v4264_v8 = vld [vmem:[#allocation11 + $0x44] ss:$8 sps:$4 sm:$0xff]  }
 0x2d0   :  { %2567 = vmatprep.subr.bf16.mxu0 %v3763_v32  ;;  %v3819_v32 = vcombine.high %v838_v25, %v842_v27 }
 0x2d2   :  { %2527 = vmatpush1.bf16.msra.mxu1 %v3888_v37  ;;  %v3944_v37 = vcombine.low %v965_v23, %v969_v24  ;;  %v4267_v23 = vld [vmem:[#allocation11 + $0x54] ss:$8 sps:$4 sm:$0xff]  }
 0x2d3   :  { %2568 = vmatpush1.bf16.msra.mxu0 %v3762_v38  ;;  %2528 = vmatprep.subr.bf16.mxu1 %v3897_v39  ;;  %v3818_v38 = vcombine.low %v838_v25, %v842_v27  ;;  %v3953_v39 = vcombine.high %v973_v33, %v977_v34  ;;  %v910_v25 = vld [vmem:[#allocation10 + $0x598] sm:$0xff] }
 0x2d4   :  { %2569 = vmatprep.subr.bf16.mxu0 %v3771_v40  ;;  %v3827_v40 = vcombine.high %v846_v35, %v850_v36  ;;  %v914_v27 = vld [vmem:[#allocation10 + $0x5b8] sm:$0xff] }
 0x2d6   :  { %2529 = vmatpush1.bf16.msra.mxu1 %v3896_v44  ;;  %v3952_v44 = vcombine.low %v973_v33, %v977_v34  ;;  %v3891_v33 = vcombine.high %v910_v25, %v914_v27 }
 0x2d7   :  { %2570 = vmatpush1.bf16.msra.mxu0 %v3770_v49  ;;  %2530 = vmatprep.subr.bf16.mxu1 %v3905_v51  ;;  %v3826_v49 = vcombine.low %v846_v35, %v850_v36  ;;  %v3961_v51 = vcombine.high %v981_v41, %v985_v42  ;;  %v918_v35 = vld [vmem:[#allocation10 + $0x5d8] sm:$0xff] }
 0x2d8   :  { %2571 = vmatprep.subr.bf16.mxu0 %v3779_v52  ;;  %v3835_v52 = vcombine.high %v854_v47, %v858_v43  ;;  %v922_v36 = vld [vmem:[#allocation10 + $0x5f8] sm:$0xff] }
 0x2d9   :  { %v4273_v41 = vld [vmem:[#allocation11 + $0x74] ss:$8 sps:$4 sm:$0xff]   ;;  %v3899_v42 = vcombine.high %v918_v35, %v922_v36 }
 0x2da   :  { %2531 = vmatpush1.bf16.msra.mxu1 %v3904_v57  ;;  %v4252_v57 = vld [vmem:[#allocation11 + $0x4] ss:$8 sps:$4 sm:$0xff]   ;;  %v926_v47 = vld [vmem:[#allocation10 + $0x618] sm:$0xff] }
 0x2db   :  { %2572 = vmatpush1.bf16.msra.mxu0 %v3778_v58  ;;  %2532 = vmatprep.subr.bf16.mxu1 %v3913_v60  ;;  %v3843_v58 = vcombine.high %v862_v53, %v866_v54  ;;  %v870_v60 = vld [vmem:[#allocation10 + $0x458] sm:$0xff] }
 0x2dc   :  { %2573 = vmatprep.subr.bf16.mxu0 %v3787_v61  ;;  %v874_v61 = vld [vmem:[#allocation10 + $0x478] sm:$0xff] }
 0x2dd   :  { %v3851_v3 = vcombine.high %v870_v60, %v874_v61  ;;  %v930_v43 = vld [vmem:[#allocation10 + $0x638] sm:$0xff] }
 0x2de   :  { %2533 = vmatpush1.bf16.msra.mxu1 %v3912_v5  ;;  %v878_v5 = vld [vmem:[#allocation10 + $0x498] sm:$0xff] }
 0x2df   :  { %2574 = vmatpush1.bf16.msra.mxu0 %v3786_v6  ;;  %2534 = vmatprep.subr.bf16.mxu1 %v3921_v9  ;;  %v882_v6 = vld [vmem:[#allocation10 + $0x4b8] sm:$0xff] }
 0x2e0   :  { %2575 = vmatprep.subr.bf16.mxu0 %v3795_v10  ;;  %v4253_v9 = vld [vmem:[#allocation11 + $0x10] ss:$8 sps:$4 sm:$0xff]   ;;  %v3850_v10 = vcombine.low %v870_v60, %v874_v61  ;;  %v3859_v13 = vcombine.high %v878_v5, %v882_v6 }
 0x2e1   :  { %v934_v53 = vld [vmem:[#allocation10 + $0x658] sm:$0xff] }
 0x2e2   :  { %2535 = vmatpush1.bf16.msra.mxu1 %v3920_v15  ;;  %v4256_v15 = vld [vmem:[#allocation11 + $0x20] ss:$8 sps:$4 sm:$0xff]   ;;  %v938_v54 = vld [vmem:[#allocation10 + $0x678] sm:$0xff] }
 0x2e3   :  { %2576 = vmatpush1.bf16.msra.mxu0 %v3794_v16  ;;  %2536 = vmatprep.subr.bf16.mxu1 %v3929_v17  ;;  %v3858_v16 = vcombine.low %v878_v5, %v882_v6  ;;  %v4261_v17 = vld [vmem:[#allocation11 + $0x34] ss:$8 sps:$4 sm:$0xff]  }
 0x2e4   :  { %2577 = vmatprep.subr.bf16.mxu0 %v3803_v18  ;;  %v894_v18 = vld [vmem:[#allocation10 + $0x518] sm:$0xff] }
 0x2e5   :  { %v3875_v12 = vcombine.high %v894_v18, %v898_v19  ;;  %v942_v60 = vld [vmem:[#allocation10 + $0x698] sm:$0xff] }
 0x2e6   :  { %2537 = vmatpush1.bf16.msra.mxu1 %v3928_v50  ;;  %v902_v50 = vld [vmem:[#allocation10 + $0x558] sm:$0xff] }
 0x2e7   :  { %2578 = vmatpush1.bf16.msra.mxu0 %v3802_v20  ;;  %2538 = vmatprep.subr.bf16.mxu1 %v3937_v21  ;;  %v906_v20 = vld [vmem:[#allocation10 + $0x578] sm:$0xff]  ;;  %v4262_v21 = vld [vmem:[#allocation11 + $0x40] ss:$8 sps:$4 sm:$0xff]  }
 0x2e8   :  { %2579 = vmatprep.subr.bf16.mxu0 %v3811_v22  ;;  %v3874_v22 = vcombine.low %v894_v18, %v898_v19  ;;  %v3883_v24 = vcombine.high %v902_v50, %v906_v20  ;;  %v946_v61 = vld [vmem:[#allocation10 + $0x6b8] sm:$0xff] }
 0x2e9   :  { %v950_v5 = vld [vmem:[#allocation10 + $0x6d8] sm:$0xff] }
 0x2ea   :  { %2539 = vmatpush1.bf16.msra.mxu1 %v3936_v29  ;;  %v4265_v29 = vld [vmem:[#allocation11 + $0x50] ss:$8 sps:$4 sm:$0xff]  }
 0x2eb   :  { %2580 = vmatpush1.bf16.msra.mxu0 %v3810_v30  ;;  %2540 = vmatprep.subr.bf16.mxu1 %v3945_v31  ;;  %v3882_v30 = vcombine.low %v902_v50, %v906_v20  ;;  %v4270_v31 = vld [vmem:[#allocation11 + $0x64] ss:$8 sps:$4 sm:$0xff]   ;;  %v954_v6 = vld [vmem:[#allocation10 + $0x6f8] sm:$0xff] }
 0x2ec   :  { %2581 = vmatprep.subr.bf16.mxu0 %v3819_v32  ;;  %v966_v18 = vld [vmem:[#allocation10 + $0x758] sm:$0xff] }
 0x2ed   :  { %v970_v19 = vld [vmem:[#allocation10 + $0x778] sm:$0xff] }
 0x2ee   :  { %2541 = vmatpush1.bf16.msra.mxu1 %v3944_v37  ;;  %v974_v50 = vld [vmem:[#allocation10 + $0x798] sm:$0xff] }
 0x2ef   :  { %2582 = vmatpush1.bf16.msra.mxu0 %v3818_v38  ;;  %2542 = vmatprep.subr.bf16.mxu1 %v3953_v39  ;;  %v4268_v38 = vld [vmem:[#allocation11 + $0x60] ss:$8 sps:$4 sm:$0xff]   ;;  %v978_v20 = vld [vmem:[#allocation10 + $0x7b8] sm:$0xff] }
 0x2f0   :  { %2583 = vmatprep.subr.bf16.mxu0 %v3827_v40  ;;  %v3890_v40 = vcombine.low %v910_v25, %v914_v27  ;;  %v982_v25 = vld [vmem:[#allocation10 + $0x7d8] sm:$0xff] }
 0x2f1   :  { %v986_v27 = vld [vmem:[#allocation10 + $0x7f8] sm:$0xff] }
 0x2f2   :  { %2543 = vmatpush1.bf16.msra.mxu1 %v3952_v44  ;;  %v4271_v44 = vld [vmem:[#allocation11 + $0x70] ss:$8 sps:$4 sm:$0xff]  }
 0x2f3   :  { %2584 = vmatpush1.bf16.msra.mxu0 %v3826_v49  ;;  %2544 = vmatprep.subr.bf16.mxu1 %v3961_v51  ;;  %v3898_v49 = vcombine.low %v918_v35, %v922_v36  ;;  %v4276_v51 = vld [vmem:[#allocation11 + $0x84] ss:$8 sps:$4 sm:$0xff]   ;;  %v4295_v35 = vld [vmem:[#allocation11 + $0xf0] ss:$8 sps:$4 sm:$0xff]   ;;  %v3962_v36 = vcombine.low %v982_v25, %v986_v27 }
 0x2f4   :  { %2585 = vmatprep.subr.bf16.mxu0 %v3835_v52  ;;  %v3907_v52 = vcombine.high %v926_v47, %v930_v43 }
 0x2f6   :  { %2545 = vmatpush1.bf16.msra.mxu1 %v3960_v55  ;;  %v4274_v55 = vld [vmem:[#allocation11 + $0x80] ss:$8 sps:$4 sm:$0xff]  }
 0x2f7   :  { %2586 = vmatpush1.bf16.msra.mxu0 %v3834_v56  ;;  %3449 = vmatprep.subr.bf16.mxu1 %v4252_v57  ;;  %v3906_v56 = vcombine.low %v926_v47, %v930_v43  ;;  %v4279_v57 = vld [vmem:[#allocation11 + $0x94] ss:$8 sps:$4 sm:$0xff]  }
 0x2f8   :  { %2596 = vmatprep.subr.bf16.mxu0 %v3843_v58  ;;  %v3915_v58 = vcombine.high %v934_v53, %v938_v54 }
 0x2f9   :  { %2547 = vmatmul.mubr.bf16.vlgmr.msra.gmra.mrb[4].mxu1 %v4811_v28 }
 0x2fa   :  { %2588 = vmatmul.mubr.bf16.vlgmr.msra.gmra.mrb[20].mxu0 %v4793_v2  ;;  %3450 = vmatpush1.bf16.msra.mxu1 %v4250_v63  ;;  %v3867_v2 = vcombine.high %v886_v1, %v890_v14  ;;  %v4277_v63 = vld [vmem:[#allocation11 + $0x90] ss:$8 sps:$4 sm:$0xff]  }
 0x2fb   :  { %2597 = vmatpush1.bf16.msra.mxu0 %v3842_v0  ;;  %2628 = vmatprep.mubr.bf16.mxu0 %v4809_v26  ;;  %v3866_v26 = vcombine.low %v886_v1, %v890_v14  ;;  %v3914_v0 = vcombine.low %v934_v53, %v938_v54  ;;  %v958_v1 = vld [vmem:[#allocation10 + $0x718] sm:$0xff] }
 0x2fc   :  { %2598 = vmatprep.subr.bf16.mxu0 %v3851_v3  ;;  %3451 = vmatprep.subr.bf16.mxu1 %v4255_v4  ;;  %v4282_v3 = vld [vmem:[#allocation11 + $0xa4] ss:$8 sps:$4 sm:$0xff]   ;;  %v3923_v4 = vcombine.high %v942_v60, %v946_v61  ;;  %v962_v14 = vld [vmem:[#allocation10 + $0x738] sm:$0xff] }
 0x2fe   :  { %3452 = vmatpush1.bf16.msra.mxu1 %v4253_v9  ;;  %v4280_v9 = vld [vmem:[#allocation11 + $0xa0] ss:$8 sps:$4 sm:$0xff]  }
 0x2ff   :  { %2599 = vmatpush1.bf16.msra.mxu0 %v3850_v10  ;;  %3453 = vmatprep.subr.bf16.mxu1 %v4258_v11  ;;  %v3922_v10 = vcombine.low %v942_v60, %v946_v61  ;;  %v4285_v11 = vld [vmem:[#allocation11 + $0xb4] ss:$8 sps:$4 sm:$0xff]   ;;  %v4304_v61 = vld [vmem:[#allocation11 + $0x120] ss:$8 sps:$4 sm:$0xff]  }
 0x300   :  { %2600 = vmatprep.subr.bf16.mxu0 %v3859_v13  ;;  %v3931_v13 = vcombine.high %v950_v5, %v954_v6  ;;  %v4303_v60 = vld [vmem:[#allocation11 + $0x114] ss:$8 sps:$4 sm:$0xff]  }
 0x302   :  { %3454 = vmatpush1.bf16.msra.mxu1 %v4256_v15  ;;  %v4283_v15 = vld [vmem:[#allocation11 + $0xb0] ss:$8 sps:$4 sm:$0xff]  }
 0x303   :  { %2601 = vmatpush1.bf16.msra.mxu0 %v3858_v16  ;;  %3455 = vmatprep.subr.bf16.mxu1 %v4261_v17  ;;  %v3930_v16 = vcombine.low %v950_v5, %v954_v6  ;;  %v4288_v17 = vld [vmem:[#allocation11 + $0xc4] ss:$8 sps:$4 sm:$0xff]   ;;  %v4315_v5 = vld [vmem:[#allocation11 + $0x154] ss:$8 sps:$4 sm:$0xff]   ;;  %v4313_v6 = vld [vmem:[#allocation11 + $0x150] ss:$8 sps:$4 sm:$0xff]  }
 0x304   :  { %2602 = vmatprep.subr.bf16.mxu0 %v3867_v2  ;;  %v3939_v2 = vcombine.high %v958_v1, %v962_v14 }
 0x306   :  { %3456 = vmatpush1.bf16.msra.mxu1 %v4259_v7  ;;  %v4286_v7 = vld [vmem:[#allocation11 + $0xc0] ss:$8 sps:$4 sm:$0xff]  }
 0x307   :  { %2603 = vmatpush1.bf16.msra.mxu0 %v3866_v26  ;;  %3457 = vmatprep.subr.bf16.mxu1 %v4264_v8  ;;  %v3938_v26 = vcombine.low %v958_v1, %v962_v14  ;;  %v4291_v8 = vld [vmem:[#allocation11 + $0xd4] ss:$8 sps:$4 sm:$0xff]   ;;  %v4324_v1 = vld [vmem:[#allocation11 + $0x184] ss:$8 sps:$4 sm:$0xff]   ;;  %v4322_v14 = vld [vmem:[#allocation11 + $0x180] ss:$8 sps:$4 sm:$0xff]  }
 0x308   :  { %2604 = vmatprep.subr.bf16.mxu0 %v3875_v12  ;;  %v3947_v12 = vcombine.high %v966_v18, %v970_v19 }
 0x30a   :  { %3458 = vmatpush1.bf16.msra.mxu1 %v4262_v21  ;;  %v4289_v21 = vld [vmem:[#allocation11 + $0xd0] ss:$8 sps:$4 sm:$0xff]  }
 0x30b   :  { %2605 = vmatpush1.bf16.msra.mxu0 %v3874_v22  ;;  %3459 = vmatprep.subr.bf16.mxu1 %v4267_v23  ;;  %v3946_v22 = vcombine.low %v966_v18, %v970_v19  ;;  %v4294_v23 = vld [vmem:[#allocation11 + $0xe4] ss:$8 sps:$4 sm:$0xff]   ;;  %v4333_v18 = vld [vmem:[#allocation11 + $0x1b4] ss:$8 sps:$4 sm:$0xff]   ;;  %v4331_v19 = vld [vmem:[#allocation11 + $0x1b0] ss:$8 sps:$4 sm:$0xff]  }
 0x30c   :  { %v4828_v32 = vpop.f32.mrb[12].mxu0  ;;  %2606 = vmatprep.subr.bf16.mxu0 %v3883_v24  ;;  %v3955_v24 = vcombine.high %v974_v50, %v978_v20 }
 0x30d   :  { %v4830_v34 = vpop.f32.mrb[13].mxu0 }
 0x30e   :  { %v2347_v37 = vpop.f32.mrb[14].mxu0  ;;  %3460 = vmatpush1.bf16.msra.mxu1 %v4265_v29  ;;  %v4292_v29 = vld [vmem:[#allocation11 + $0xe0] ss:$8 sps:$4 sm:$0xff]  }
 0x30f   :  { %2607 = vmatpush1.bf16.msra.mxu0 %v3882_v30  ;;  %v2348_v39 = vpop.f32.mrb[15].mxu0  ;;  %3461 = vmatprep.subr.bf16.mxu1 %v4270_v31  ;;  %v3954_v30 = vcombine.low %v974_v50, %v978_v20  ;;  %v4297_v31 = vld [vmem:[#allocation11 + $0xf4] ss:$8 sps:$4 sm:$0xff]   ;;  %v4300_v37 = vld [vmem:[#allocation11 + $0x104] ss:$8 sps:$4 sm:$0xff]  }
 0x310   :  { %2608 = vmatprep.subr.bf16.mxu0 %v3891_v33  ;;  %v3963_v33 = vcombine.high %v982_v25, %v986_v27  ;;  %v4342_v50 = vld [vmem:[#allocation11 + $0x1e4] ss:$8 sps:$4 sm:$0xff]  }
 0x312   :  { %3462 = vmatpush1.bf16.msra.mxu1 %v4268_v38  ;;  %v4836_v38 = vld [vmem:[%s4881_s6] sm:$0xff] }
 0x313   :  { %2609 = vmatpush1.bf16.msra.mxu0 %v3890_v40  ;;  %3463 = vmatprep.subr.bf16.mxu1 %v4273_v41  ;;  %v992_v39 = vrot.slane %v4836_v38, %v4755_v46  ;;  %v996_v40 = vrot.slane %v4836_v38, %v4761_v48  ;;  %v1000_v20 = vrot.slane %v4836_v38, %v303_v59 }
 0x314   :  { %2610 = vmatprep.subr.bf16.mxu0 %v3899_v42 }
 0x315   :  { %v2344_v41 = vadd.f32 %v4828_v32, %v992_v39  ;;  %v2346_v42 = vadd.f32 %v4830_v34, %v996_v40  ;;  %v4301_v32 = vld [vmem:[#allocation11 + $0x110] ss:$8 sps:$4 sm:$0xff]   ;;  %v4306_v34 = vld [vmem:[#allocation11 + $0x124] ss:$8 sps:$4 sm:$0xff]   ;;  %v4346_v40 = vld [vmem:[#allocation11 + $0x200] ss:$8 sps:$4 sm:$0xff]  }
 0x316   :  { %3464 = vmatpush1.bf16.msra.mxu1 %v4271_v44 }
 0x317   :  { %2611 = vmatpush1.bf16.msra.mxu0 %v3898_v49  ;;  %3465 = vmatprep.subr.bf16.mxu1 %v4276_v51 }
 0x318   :  { %2612 = vmatprep.subr.bf16.mxu0 %v3907_v52 }
 0x31a   :  { %3466 = vmatpush1.bf16.msra.mxu1 %v4274_v55 }
 0x31b   :  { %2613 = vmatpush1.bf16.msra.mxu0 %v3906_v56  ;;  %3467 = vmatprep.subr.bf16.mxu1 %v4279_v57  ;;  %v4298_v57 = vld [vmem:[#allocation11 + $0x100] ss:$8 sps:$4 sm:$0xff]  }
 0x31c   :  { %2614 = vmatprep.subr.bf16.mxu0 %v3915_v58 }
 0x31e   :  { %3468 = vmatpush1.bf16.msra.mxu1 %v4277_v63  ;;  %v4309_v63 = vld [vmem:[#allocation11 + $0x134] ss:$8 sps:$4 sm:$0xff]  }
 0x31f   :  { %2615 = vmatpush1.bf16.msra.mxu0 %v3914_v0  ;;  %3469 = vmatprep.subr.bf16.mxu1 %v4282_v3  ;;  %v4307_v0 = vld [vmem:[#allocation11 + $0x130] ss:$8 sps:$4 sm:$0xff]   ;;  %v4312_v3 = vld [vmem:[#allocation11 + $0x144] ss:$8 sps:$4 sm:$0xff]  }
 0x320   :  { %2616 = vmatprep.subr.bf16.mxu0 %v3923_v4  ;;  %v4310_v4 = vld [vmem:[#allocation11 + $0x140] ss:$8 sps:$4 sm:$0xff]  }
 0x322   :  { %3470 = vmatpush1.bf16.msra.mxu1 %v4280_v9  ;;  %v4318_v9 = vld [vmem:[#allocation11 + $0x164] ss:$8 sps:$4 sm:$0xff]  }
 0x323   :  { %2617 = vmatpush1.bf16.msra.mxu0 %v3922_v10  ;;  %3471 = vmatprep.subr.bf16.mxu1 %v4285_v11  ;;  %v4316_v10 = vld [vmem:[#allocation11 + $0x160] ss:$8 sps:$4 sm:$0xff]   ;;  %v4321_v11 = vld [vmem:[#allocation11 + $0x174] ss:$8 sps:$4 sm:$0xff]  }
 0x324   :  { %2618 = vmatprep.subr.bf16.mxu0 %v3931_v13  ;;  %v4319_v13 = vld [vmem:[#allocation11 + $0x170] ss:$8 sps:$4 sm:$0xff]  }
 0x326   :  { %3472 = vmatpush1.bf16.msra.mxu1 %v4283_v15  ;;  %v4327_v15 = vld [vmem:[#allocation11 + $0x194] ss:$8 sps:$4 sm:$0xff]  }
 0x327   :  { %2619 = vmatpush1.bf16.msra.mxu0 %v3930_v16  ;;  %3473 = vmatprep.subr.bf16.mxu1 %v4288_v17  ;;  %v4325_v16 = vld [vmem:[#allocation11 + $0x190] ss:$8 sps:$4 sm:$0xff]   ;;  %v4330_v17 = vld [vmem:[#allocation11 + $0x1a4] ss:$8 sps:$4 sm:$0xff]  }
 0x328   :  { %2620 = vmatprep.subr.bf16.mxu0 %v3939_v2  ;;  %v4328_v2 = vld [vmem:[#allocation11 + $0x1a0] ss:$8 sps:$4 sm:$0xff]  }
 0x32a   :  { %3474 = vmatpush1.bf16.msra.mxu1 %v4286_v7  ;;  %v4336_v7 = vld [vmem:[#allocation11 + $0x1c4] ss:$8 sps:$4 sm:$0xff]  }
 0x32b   :  { %2621 = vmatpush1.bf16.msra.mxu0 %v3938_v26  ;;  %3475 = vmatprep.subr.bf16.mxu1 %v4291_v8  ;;  %v4334_v26 = vld [vmem:[#allocation11 + $0x1c0] ss:$8 sps:$4 sm:$0xff]   ;;  %v4339_v8 = vld [vmem:[#allocation11 + $0x1d4] ss:$8 sps:$4 sm:$0xff]  }
 0x32c   :  { %2622 = vmatprep.subr.bf16.mxu0 %v3947_v12  ;;  %v4337_v12 = vld [vmem:[#allocation11 + $0x1d0] ss:$8 sps:$4 sm:$0xff]  }
 0x32e   :  { %3476 = vmatpush1.bf16.msra.mxu1 %v4289_v21  ;;  %v1004_v21 = vrot.slane %v4836_v38, %v307_v62 }
 0x32f   :  { %2623 = vmatpush1.bf16.msra.mxu0 %v3946_v22  ;;  %3477 = vmatprep.subr.bf16.mxu1 %v4294_v23  ;;  %v4340_v22 = vld [vmem:[#allocation11 + $0x1e0] ss:$8 sps:$4 sm:$0xff]  }
 0x330   :  { %2624 = vmatprep.subr.bf16.mxu0 %v3955_v24  ;;  %v4345_v24 = vld [vmem:[#allocation11 + $0x1f4] ss:$8 sps:$4 sm:$0xff]  }
 0x332   :  { %3478 = vmatpush1.bf16.msra.mxu1 %v4292_v29 }
 0x333   :  { %2625 = vmatpush1.bf16.msra.mxu0 %v3954_v30  ;;  %3479 = vmatprep.subr.bf16.mxu1 %v4297_v31 }
 0x334   :  { %2626 = vmatprep.subr.bf16.mxu0 %v3963_v33 }
 0x336   :  { %3480 = vmatpush1.bf16.msra.mxu1 %v4295_v35  ;;  %v4343_v35 = vld [vmem:[#allocation11 + $0x1f0] ss:$8 sps:$4 sm:$0xff]  }
 0x337   :  { %2627 = vmatpush1.bf16.msra.mxu0 %v3962_v36  ;;  %3490 = vmatprep.subr.bf16.mxu1 %v4300_v37  ;;  %v4348_v36 = vld [vmem:[#allocation11 + $0x204] ss:$8 sps:$4 sm:$0xff]  }
 0x33a   :  { %2629 = vmatmul.mubr.bf16.vlgmr.msra.gmra.mrb[20].mxu0 %v4811_v28 }
 0x34c   :  { %v2384_v47 = vpop.f32.mrb[0].mxu1 }
 0x34d   :  { %v2385_v43 = vadd.f32 %v2384_v47, %v2344_v41  ;;  %v2386_v44 = vpop.f32.mrb[1].mxu1  ;;  %v4349_v47 = vld [vmem:[#allocation11 + $0x210] ss:$8 sps:$4 sm:$0xff]  }
 0x34e   :  { %v2387_v49 = vadd.f32 %v2386_v44, %v2346_v42  ;;  %v2388_v28 = vpop.f32.mrb[2].mxu1  ;;  %v4351_v42 = vld [vmem:[#allocation11 + $0x214] ss:$8 sps:$4 sm:$0xff]   ;;  %v4352_v44 = vld [vmem:[#allocation11 + $0x220] ss:$8 sps:$4 sm:$0xff]  }
 0x34f   :  { %vm2637_vm7 = vcmp.gt.f32.partialorder %v2385_v43, 0.0  ;;  %v2645_v51 = vmul.f32 0.1, %v2385_v43  ;;  %v2389_v52 = vpop.f32.mrb[3].mxu1  ;;  %v4355_v28 = vld [vmem:[#allocation11 + $0x230] ss:$8 sps:$4 sm:$0xff]  }
 0x350   :  { %vm2638_vm8 = vcmp.gt.f32.partialorder %v2387_v49, 0.0  ;;  %v2646_v53 = vmul.f32 0.1, %v2387_v49  ;;  %v4358_v52 = vld [vmem:[#allocation11 + $0x240] ss:$8 sps:$4 sm:$0xff]  }
 0x351   :  { %v2653_v54 = vsel %vm2637_vm7, %v2385_v43, %v2645_v51  ;;  %v4354_v43 = vld [vmem:[#allocation11 + $0x224] ss:$8 sps:$4 sm:$0xff]  }
 0x352   :  { %v2654_v55 = vsel %vm2638_vm8, %v2387_v49, %v2646_v53  ;;  %v2661_v58 = vpack.c.bf16 %v2653_v54, %v2653_v54  ;;  %v4357_v49 = vld [vmem:[#allocation11 + $0x234] ss:$8 sps:$4 sm:$0xff]   ;;  %v4360_v51 = vld [vmem:[#allocation11 + $0x244] ss:$8 sps:$4 sm:$0xff]   ;;  %v4361_v54 = vld [vmem:[#allocation11 + $0x250] ss:$8 sps:$4 sm:$0xff]  }
 0x353   :  { %v2662_v56 = vpack.c.bf16 %v2654_v55, %v2654_v55  ;;  %v4363_v53 = vld [vmem:[#allocation11 + $0x254] ss:$8 sps:$4 sm:$0xff]   ;;  %v4366_v55 = vld [vmem:[#allocation11 + $0x264] ss:$8 sps:$4 sm:$0xff]  }
 0x355   :  { %3481 = vmatprep.mubr.bf16.mxu1 %v2662_v56  ;;  %v4364_v56 = vld [vmem:[#allocation11 + $0x260] ss:$8 sps:$4 sm:$0xff]  }
 0x356   :  { %3482 = vmatmul.mubr.bf16.vlgmr.msra.gmra.mrb[8].mxu1 %v2661_v58  ;;  %v4367_v58 = vld [vmem:[#allocation11 + $0x270] ss:$8 sps:$4 sm:$0xff]  }
 0x357   :  { %3491 = vmatpush1.bf16.msra.mxu1 %v4298_v57  ;;  %v4369_v57 = vld [vmem:[#allocation11 + $0x274] ss:$8 sps:$4 sm:$0xff]  }
 0x358   :  { %3492 = vmatprep.subr.bf16.mxu1 %v4303_v60  ;;  %v4372_v60 = vld [vmem:[#allocation11 + $0x284] ss:$8 sps:$4 sm:$0xff]  }
 0x35b   :  { %3493 = vmatpush1.bf16.msra.mxu1 %v4301_v32  ;;  %v4370_v32 = vld [vmem:[#allocation11 + $0x280] ss:$8 sps:$4 sm:$0xff]  }
 0x35c   :  { %3494 = vmatprep.subr.bf16.mxu1 %v4306_v34  ;;  %v4375_v34 = vld [vmem:[#allocation11 + $0x294] ss:$8 sps:$4 sm:$0xff]  }
 0x35f   :  { %3495 = vmatpush1.bf16.msra.mxu1 %v4304_v61  ;;  %v4373_v61 = vld [vmem:[#allocation11 + $0x290] ss:$8 sps:$4 sm:$0xff]  }
 0x360   :  { %3496 = vmatprep.subr.bf16.mxu1 %v4309_v63  ;;  %v4378_v63 = vld [vmem:[#allocation11 + $0x2a4] ss:$8 sps:$4 sm:$0xff]  }
 0x363   :  { %3497 = vmatpush1.bf16.msra.mxu1 %v4307_v0  ;;  %v4376_v0 = vld [vmem:[#allocation11 + $0x2a0] ss:$8 sps:$4 sm:$0xff]  }
 0x364   :  { %3498 = vmatprep.subr.bf16.mxu1 %v4312_v3  ;;  %v4381_v3 = vld [vmem:[#allocation11 + $0x2b4] ss:$8 sps:$4 sm:$0xff]  }
 0x367   :  { %3499 = vmatpush1.bf16.msra.mxu1 %v4310_v4  ;;  %v4379_v4 = vld [vmem:[#allocation11 + $0x2b0] ss:$8 sps:$4 sm:$0xff]  }
 0x368   :  { %3500 = vmatprep.subr.bf16.mxu1 %v4315_v5  ;;  %v4384_v5 = vld [vmem:[#allocation11 + $0x2c4] ss:$8 sps:$4 sm:$0xff]  }
 0x36b   :  { %3501 = vmatpush1.bf16.msra.mxu1 %v4313_v6  ;;  %v4382_v6 = vld [vmem:[#allocation11 + $0x2c0] ss:$8 sps:$4 sm:$0xff]  }
 0x36c   :  { %3502 = vmatprep.subr.bf16.mxu1 %v4318_v9  ;;  %v4387_v9 = vld [vmem:[#allocation11 + $0x2d4] ss:$8 sps:$4 sm:$0xff]  }
 0x36f   :  { %3503 = vmatpush1.bf16.msra.mxu1 %v4316_v10  ;;  %v1007_v10 = vsub.s32 4, %v4752_v45 }
 0x370   :  { %3504 = vmatprep.subr.bf16.mxu1 %v4321_v11  ;;  %v1011_v11 = vsub.s32 5, %v4752_v45 }
 0x373   :  { %3505 = vmatpush1.bf16.msra.mxu1 %v4319_v13  ;;  %v4385_v13 = vld [vmem:[#allocation11 + $0x2d0] ss:$8 sps:$4 sm:$0xff]  }
 0x374   :  { %3506 = vmatprep.subr.bf16.mxu1 %v4324_v1  ;;  %v4390_v1 = vld [vmem:[#allocation11 + $0x2e4] ss:$8 sps:$4 sm:$0xff]  }
 0x377   :  { %3507 = vmatpush1.bf16.msra.mxu1 %v4322_v14  ;;  %v1008_v14 = vrot.slane %v4836_v38, %v1007_v10 }
 0x378   :  { %3508 = vmatprep.subr.bf16.mxu1 %v4327_v15  ;;  %v1012_v15 = vrot.slane %v4836_v38, %v1011_v11  ;;  %v4439_v11 = vld [vmem:[#allocation11 + $0x3f0] ss:$8 sps:$4 sm:$0xff]  }
 0x37b   :  { %3509 = vmatpush1.bf16.msra.mxu1 %v4325_v16  ;;  %v4388_v16 = vld [vmem:[#allocation11 + $0x2e0] ss:$8 sps:$4 sm:$0xff]  }
 0x37c   :  { %3510 = vmatprep.subr.bf16.mxu1 %v4330_v17 }
 0x37f   :  { %3511 = vmatpush1.bf16.msra.mxu1 %v4328_v2  ;;  %v4393_v2 = vld [vmem:[#allocation11 + $0x2f4] ss:$8 sps:$4 sm:$0xff]  }
 0x380   :  { %3512 = vmatprep.subr.bf16.mxu1 %v4333_v18 }
 0x383   :  { %3513 = vmatpush1.bf16.msra.mxu1 %v4331_v19 }
 0x384   :  { %3514 = vmatprep.subr.bf16.mxu1 %v4336_v7 }
 0x387   :  { %3515 = vmatpush1.bf16.msra.mxu1 %v4334_v26 }
 0x388   :  { %3516 = vmatprep.subr.bf16.mxu1 %v4339_v8 }
 0x38b   :  { %3517 = vmatpush1.bf16.msra.mxu1 %v4337_v12 }
 0x38c   :  { %v2466_v23 = vpop.f32.mrb[16].mxu0  ;;  %3518 = vmatprep.subr.bf16.mxu1 %v4342_v50  ;;  %v4391_v50 = vld [vmem:[#allocation11 + $0x2f0] ss:$8 sps:$4 sm:$0xff]  }
 0x38d   :  { %v4096_v25 = vadd.f32 %v2466_v23, %v1000_v20  ;;  %v2468_v27 = vpop.f32.mrb[17].mxu0 }
 0x38e   :  { %v4097_v29 = vadd.f32 %v2468_v27, %v1004_v21  ;;  %v2470_v30 = vpop.f32.mrb[18].mxu0  ;;  %v4396_v21 = vld [vmem:[#allocation11 + $0x304] ss:$8 sps:$4 sm:$0xff]  }
 0x38f   :  { %vm2639_vm9 = vcmp.gt.f32.partialorder %v4096_v25, 0.0  ;;  %v2647_v31 = vmul.f32 0.1, %v4096_v25  ;;  %3519 = vmatpush1.bf16.msra.mxu1 %v4340_v22  ;;  %v2471_v33 = vpop.f32.mrb[19].mxu0  ;;  %v4397_v30 = vld [vmem:[#allocation11 + $0x310] ss:$8 sps:$4 sm:$0xff]  }
 0x390   :  { %vm2640_vm10 = vcmp.gt.f32.partialorder %v4097_v29, 0.0  ;;  %v2648_v59 = vmul.f32 0.1, %v4097_v29  ;;  %3520 = vmatprep.subr.bf16.mxu1 %v4345_v24  ;;  %v4400_v33 = vld [vmem:[#allocation11 + $0x320] ss:$8 sps:$4 sm:$0xff]  }
 0x391   :  { %v2655_v37 = vsel %vm2639_vm9, %v4096_v25, %v2647_v31  ;;  %v4394_v25 = vld [vmem:[#allocation11 + $0x300] ss:$8 sps:$4 sm:$0xff]   ;;  %v4402_v31 = vld [vmem:[#allocation11 + $0x324] ss:$8 sps:$4 sm:$0xff]  }
 0x392   :  { %v2656_v62 = vsel %vm2640_vm10, %v4097_v29, %v2648_v59  ;;  %v2663_v41 = vpack.c.bf16 %v2655_v37, %v2655_v37  ;;  %v4399_v29 = vld [vmem:[#allocation11 + $0x314] ss:$8 sps:$4 sm:$0xff]   ;;  %v4403_v59 = vld [vmem:[#allocation11 + $0x330] ss:$8 sps:$4 sm:$0xff]   ;;  %v4406_v37 = vld [vmem:[#allocation11 + $0x340] ss:$8 sps:$4 sm:$0xff]  }
 0x393   :  { %3521 = vmatpush1.bf16.msra.mxu1 %v4343_v35  ;;  %v2664_v39 = vpack.c.bf16 %v2656_v62, %v2656_v62  ;;  %v4405_v35 = vld [vmem:[#allocation11 + $0x334] ss:$8 sps:$4 sm:$0xff]  }
 0x394   :  { %3531 = vmatprep.subr.bf16.mxu1 %v4348_v36  ;;  %v4408_v36 = vld [vmem:[#allocation11 + $0x344] ss:$8 sps:$4 sm:$0xff]   ;;  %v4411_v62 = vld [vmem:[#allocation11 + $0x354] ss:$8 sps:$4 sm:$0xff]  }
 0x395   :  { %3522 = vmatprep.mubr.bf16.mxu1 %v2664_v39  ;;  %v4409_v39 = vld [vmem:[#allocation11 + $0x350] ss:$8 sps:$4 sm:$0xff]  }
 0x396   :  { %3523 = vmatmul.mubr.bf16.vlgmr.msra.gmra.mrb[8].mxu1 %v2663_v41  ;;  %v4412_v41 = vld [vmem:[#allocation11 + $0x360] ss:$8 sps:$4 sm:$0xff]  }
 0x397   :  { %3532 = vmatpush1.bf16.msra.mxu1 %v4346_v40  ;;  %v4414_v40 = vld [vmem:[#allocation11 + $0x364] ss:$8 sps:$4 sm:$0xff]  }
 0x398   :  { %3533 = vmatprep.subr.bf16.mxu1 %v4351_v42  ;;  %v4417_v42 = vld [vmem:[#allocation11 + $0x374] ss:$8 sps:$4 sm:$0xff]  }
 0x39b   :  { %3534 = vmatpush1.bf16.msra.mxu1 %v4349_v47  ;;  %v4415_v47 = vld [vmem:[#allocation11 + $0x370] ss:$8 sps:$4 sm:$0xff]  }
 0x39c   :  { %3535 = vmatprep.subr.bf16.mxu1 %v4354_v43  ;;  %v4420_v43 = vld [vmem:[#allocation11 + $0x384] ss:$8 sps:$4 sm:$0xff]  }
 0x39f   :  { %3536 = vmatpush1.bf16.msra.mxu1 %v4352_v44  ;;  %v4418_v44 = vld [vmem:[#allocation11 + $0x380] ss:$8 sps:$4 sm:$0xff]  }
 0x3a0   :  { %3537 = vmatprep.subr.bf16.mxu1 %v4357_v49  ;;  %v4423_v49 = vld [vmem:[#allocation11 + $0x394] ss:$8 sps:$4 sm:$0xff]  }
 0x3a3   :  { %3538 = vmatpush1.bf16.msra.mxu1 %v4355_v28  ;;  %v4421_v28 = vld [vmem:[#allocation11 + $0x390] ss:$8 sps:$4 sm:$0xff]  }
 0x3a4   :  { %3539 = vmatprep.subr.bf16.mxu1 %v4360_v51  ;;  %v4426_v51 = vld [vmem:[#allocation11 + $0x3a4] ss:$8 sps:$4 sm:$0xff]  }
 0x3a7   :  { %3540 = vmatpush1.bf16.msra.mxu1 %v4358_v52  ;;  %v4424_v52 = vld [vmem:[#allocation11 + $0x3a0] ss:$8 sps:$4 sm:$0xff]  }
 0x3a8   :  { %3541 = vmatprep.subr.bf16.mxu1 %v4363_v53  ;;  %v4429_v53 = vld [vmem:[#allocation11 + $0x3b4] ss:$8 sps:$4 sm:$0xff]  }
 0x3ab   :  { %3542 = vmatpush1.bf16.msra.mxu1 %v4361_v54  ;;  %v4427_v54 = vld [vmem:[#allocation11 + $0x3b0] ss:$8 sps:$4 sm:$0xff]  }
 0x3ac   :  { %3543 = vmatprep.subr.bf16.mxu1 %v4366_v55  ;;  %v4432_v55 = vld [vmem:[#allocation11 + $0x3c4] ss:$8 sps:$4 sm:$0xff]  }
 0x3af   :  { %3544 = vmatpush1.bf16.msra.mxu1 %v4364_v56  ;;  %v4430_v56 = vld [vmem:[#allocation11 + $0x3c0] ss:$8 sps:$4 sm:$0xff]  }
 0x3b0   :  { %3545 = vmatprep.subr.bf16.mxu1 %v4369_v57  ;;  %v4435_v57 = vld [vmem:[#allocation11 + $0x3d4] ss:$8 sps:$4 sm:$0xff]  }
 0x3b3   :  { %3546 = vmatpush1.bf16.msra.mxu1 %v4367_v58  ;;  %v1015_v58 = vsub.s32 6, %v4752_v45 }
 0x3b4   :  { %3547 = vmatprep.subr.bf16.mxu1 %v4372_v60  ;;  %v4433_v60 = vld [vmem:[#allocation11 + $0x3d0] ss:$8 sps:$4 sm:$0xff]  }
 0x3b7   :  { %3548 = vmatpush1.bf16.msra.mxu1 %v4370_v32  ;;  %v1019_v32 = vsub.s32 7, %v4752_v45 }
 0x3b8   :  { %3549 = vmatprep.subr.bf16.mxu1 %v4375_v34  ;;  %v4438_v34 = vld [vmem:[#allocation11 + $0x3e4] ss:$8 sps:$4 sm:$0xff]  }
 0x3bb   :  { %3550 = vmatpush1.bf16.msra.mxu1 %v4373_v61  ;;  %v1016_v61 = vrot.slane %v4836_v38, %v1015_v58 }
 0x3bc   :  { %3551 = vmatprep.subr.bf16.mxu1 %v4378_v63  ;;  %v1020_v63 = vrot.slane %v4836_v38, %v1019_v32 }
 0x3bf   :  { %3552 = vmatpush1.bf16.msra.mxu1 %v4376_v0  ;;  %v4436_v0 = vld [vmem:[#allocation11 + $0x3e0] ss:$8 sps:$4 sm:$0xff]  }
 0x3c0   :  { %3553 = vmatprep.subr.bf16.mxu1 %v4381_v3  ;;  %v4441_v3 = vld [vmem:[#allocation11 + $0x3f4] ss:$8 sps:$4 sm:$0xff]  }
 0x3c3   :  { %3554 = vmatpush1.bf16.msra.mxu1 %v4379_v4 }
 0x3c4   :  { %3555 = vmatprep.subr.bf16.mxu1 %v4384_v5 }
 0x3c7   :  { %3556 = vmatpush1.bf16.msra.mxu1 %v4382_v6 }
 0x3c8   :  { %3557 = vmatprep.subr.bf16.mxu1 %v4387_v9 }
 0x3cb   :  { %3558 = vmatpush1.bf16.msra.mxu1 %v4385_v13 }
 0x3cc   :  { %v2548_v17 = vpop.f32.mrb[4].mxu1  ;;  %3559 = vmatprep.subr.bf16.mxu1 %v4390_v1 }
 0x3cd   :  { %v4098_v18 = vadd.f32 %v2548_v17, %v1008_v14  ;;  %v2550_v19 = vpop.f32.mrb[5].mxu1  ;;  %v2797_v17 = vld [vmem:[%s4883_s8] sm:$0x3]  ;;  %s4578_s8 = scalar_lea.vmem %s3624_s23, 256 }
 0x3ce   :  { %v4099_v7 = vadd.f32 %v2550_v19, %v1012_v15  ;;  %v2552_v26 = vpop.f32.mrb[6].mxu1  ;;  %p4579_p6 = scmp.ne.s32.totalorder %s3624_s23, %s4578_s8  ;;  %p4584_p8 = scmp.lt.s32.totalorder %s4578_s8, %s4578_s8 }
 0x3cf   :  { %vm2641_vm11 = vcmp.gt.f32.partialorder %v4098_v18, 0.0  ;;  %v2649_v8 = vmul.f32 0.1, %v4098_v18  ;;  %v2553_v12 = vpop.f32.mrb[7].mxu1  ;;  %3560 = vmatpush1.bf16.msra.mxu1 %v4388_v16 }
 0x3d0   :  { %vm2642_vm12 = vcmp.gt.f32.partialorder %v4099_v7, 0.0  ;;  %v2650_v20 = vmul.f32 0.1, %v4099_v7  ;;  %3561 = vmatprep.subr.bf16.mxu1 %v4393_v2  ;;  %v2802_v2 = vrot.slane %v2797_v17, %v4755_v46  ;;  %p4585_p9 = por %p4584_p8, %p4583_p7 }
 0x3d1   :  { %v2657_v22 = vsel %vm2641_vm11, %v4098_v18, %v2649_v8  ;;  %v2806_v18 = vrot.slane %v2797_v17, %v4761_v48 }
 0x3d2   :  { %v2658_v23 = vsel %vm2642_vm12, %v4099_v7, %v2650_v20  ;;  %v2665_v27 = vpack.c.bf16 %v2657_v22, %v2657_v22  ;;  %p4586_p10 = pnand %p4585_p9, %p4579_p6 }
 0x3d3   :  { %3562 = vmatpush1.bf16.msra.mxu1 %v4391_v50  ;;  %v2666_v24 = vpack.c.bf16 %v2658_v23, %v2658_v23 }
 0x3d4   :  { %3572 = vmatprep.subr.bf16.mxu1 %v4396_v21 }
 0x3d5   :  { %3563 = vmatprep.mubr.bf16.mxu1 %v2666_v24 }
 0x3d6   :  { %3564 = vmatmul.mubr.bf16.vlgmr.msra.gmra.mrb[8].mxu1 %v2665_v27 }
 0x3d7   :  { %3573 = vmatpush1.bf16.msra.mxu1 %v4394_v25 }
 0x3d8   :  { %3574 = vmatprep.subr.bf16.mxu1 %v4399_v29 }
 0x3db   :  { %3575 = vmatpush1.bf16.msra.mxu1 %v4397_v30 }
 0x3dc   :  { %3576 = vmatprep.subr.bf16.mxu1 %v4402_v31 }
 0x3df   :  { %3577 = vmatpush1.bf16.msra.mxu1 %v4400_v33 }
 0x3e0   :  { %3578 = vmatprep.subr.bf16.mxu1 %v4405_v35 }
 0x3e3   :  { %3579 = vmatpush1.bf16.msra.mxu1 %v4403_v59 }
 0x3e4   :  { %3580 = vmatprep.subr.bf16.mxu1 %v4408_v36 }
 0x3e7   :  { %3581 = vmatpush1.bf16.msra.mxu1 %v4406_v37 }
 0x3e8   :  { %3582 = vmatprep.subr.bf16.mxu1 %v4411_v62 }
 0x3eb   :  { %3583 = vmatpush1.bf16.msra.mxu1 %v4409_v39 }
 0x3ec   :  { %3584 = vmatprep.subr.bf16.mxu1 %v4414_v40 }
 0x3ef   :  { %3585 = vmatpush1.bf16.msra.mxu1 %v4412_v41 }
 0x3f0   :  { %3586 = vmatprep.subr.bf16.mxu1 %v4417_v42 }
 0x3f3   :  { %3587 = vmatpush1.bf16.msra.mxu1 %v4415_v47 }
 0x3f4   :  { %3588 = vmatprep.subr.bf16.mxu1 %v4420_v43 }
 0x3f7   :  { %3589 = vmatpush1.bf16.msra.mxu1 %v4418_v44 }
 0x3f8   :  { %3590 = vmatprep.subr.bf16.mxu1 %v4423_v49 }
 0x3fb   :  { %3591 = vmatpush1.bf16.msra.mxu1 %v4421_v28 }
 0x3fc   :  { %3592 = vmatprep.subr.bf16.mxu1 %v4426_v51 }
 0x3ff   :  { %3593 = vmatpush1.bf16.msra.mxu1 %v4424_v52 }
 0x400   :  { %3594 = vmatprep.subr.bf16.mxu1 %v4429_v53 }
 0x403   :  { %3595 = vmatpush1.bf16.msra.mxu1 %v4427_v54 }
 0x404   :  { %3596 = vmatprep.subr.bf16.mxu1 %v4432_v55 }
 0x407   :  { %3597 = vmatpush1.bf16.msra.mxu1 %v4430_v56 }
 0x408   :  { %3598 = vmatprep.subr.bf16.mxu1 %v4435_v57 }
 0x40b   :  { %3599 = vmatpush1.bf16.msra.mxu1 %v4433_v60 }
 0x40c   :  { %3600 = vmatprep.subr.bf16.mxu1 %v4438_v34 }
 0x40d   :  { %v2630_v4 = vpop.f32.mrb[20].mxu0 }
 0x40e   :  { %v4100_v5 = vadd.f32 %v2630_v4, %v1016_v61  ;;  %v2632_v6 = vpop.f32.mrb[21].mxu0 }
 0x40f   :  { %v4101_v9 = vadd.f32 %v2632_v6, %v1020_v63  ;;  %v2634_v10 = vpop.f32.mrb[22].mxu0  ;;  %3601 = vmatpush1.bf16.msra.mxu1 %v4436_v0 }
 0x410   :  { %vm2643_vm13 = vcmp.gt.f32.partialorder %v4100_v5, 0.0  ;;  %v2651_v13 = vmul.f32 0.1, %v4100_v5  ;;  %v2635_v45 = vpop.f32.mrb[23].mxu0  ;;  %3602 = vmatprep.subr.bf16.mxu1 %v4441_v3 }
 0x411   :  { %vm2644_vm14 = vcmp.gt.f32.partialorder %v4101_v9, 0.0  ;;  %v2652_v1 = vmul.f32 0.1, %v4101_v9 }
 0x412   :  { %v2659_v14 = vsel %vm2643_vm13, %v4100_v5, %v2651_v13 }
 0x413   :  { %3603 = vmatpush1.bf16.msra.mxu1 %v4439_v11  ;;  %v2660_v15 = vsel %vm2644_vm14, %v4101_v9, %v2652_v1  ;;  %v2667_v16 = vpack.c.bf16 %v2659_v14, %v2659_v14 }
 0x414   :  { %v2668_v38 = vpack.c.bf16 %v2660_v15, %v2660_v15 }
 0x416   :  { %3604 = vmatprep.mubr.bf16.mxu1 %v2668_v38 }
 0x417   :  { %3605 = vmatmul.mubr.bf16.vlgmr.msra.gmra.mrb[8].mxu1 %v2667_v16 }
 0x4ea   :  { %v3606_v19 = vpop.f32.mrb[8].mxu1 }
 0x4eb   :  { %v4102_v7 = vadd.f32 %v3606_v19, %v2802_v2  ;;  %v3608_v26 = vpop.f32.mrb[9].mxu1 }
 0x4ec   :  { %v4103_v8 = vadd.f32 %v3608_v26, %v2806_v18  ;;  %v3610_v12 = vpop.f32.mrb[10].mxu1 }
 0x4ed   :  { %4442 = vtanh.f32 %v4102_v7  ;;  %v3611_v50 = vpop.f32.mrb[11].mxu1 }
 0x4ee   :  { %4444 = vtanh.f32 %v4103_v8 }
 0x4f7   :  { %v4443_v20 = vpop.eup %4442 }
 0x4f8   :  { %v4445_v21 = vpop.eup %4444  ;;  %3615 = vst [vmem:[#allocation13] sm:$0xff] %v4443_v20 }
 0x4f9   :  { %3616 = vst [vmem:[#allocation13 + $0x8] sm:$0xff] %v4445_v21 }
 0x4fa   :  { %4589 = shalt.err (!%p4586_p10)
}
 0x4fb   :  { %s4590_s24 = scalar_lea.hbm %s4884_s9, 256 }
 0x4fc   :  { %p4591_p11 = scmp.ne.s32.totalorder %s4884_s9, %s4590_s24  ;;  %p4594_p12 = scmp.lt.u32.totalorder %s4590_s24, %s4884_s9 }
 0x4fe   :  { %p4596_p13 = pnand %p4594_p12, %p4591_p11 }
 0x500   :  { %4599 = shalt.err (!%p4596_p13)
}
 0x501   :  { %3626 = dma.vmem_to_hbm [thread:$0]  %s3624_s23, 256, %s4884_s9, [#allocation4]  }
 0x502   :  { %4608 = dma.done.wait [#allocation4], 256  }
 0x503   :  { %4609 = vsyncadd [#allocation4], 4294967040 }
 0x504   :  { %3630 = vsyncpa [#allocation3], 1 }
 0x505   :  { %3631 = vsyncpa [#allocation6], 1 }
 0x506   :  { %3632 = vsyncpa [#allocation9], 1 }
 0x507   :  { %3633 = vsyncpa [#allocation12], 1 }
 0x508   :  { %3634 = vsyncpa [#allocation4], 1 }

</bundles_post_ra>
